<compile_context>
chip_gen: v5e
topology: v5e:2x2
jax: 0.10.0
libtpu: 0.0.40
codegen_flags: <defaults>
</compile_context>

<pallas_src>
import functools

import jax
import jax.numpy as jnp
from jax import lax
from jax.experimental import pallas as pl
from jax.experimental.pallas import tpu as pltpu

EPS = 1e-5
LANE = 128


def _round_up(x, m):
    return ((x + m - 1) // m) * m


def _pad_axis(a, target, axis):
    pad = target - a.shape[axis]
    if pad == 0:
        return a
    widths = [(0, 0)] * a.ndim
    widths[axis] = (0, pad)
    return jnp.pad(a, widths)


def _q(a):
    """bf16 round-trip (used only by the pure-JAX reference)."""
    return a.astype(jnp.bfloat16).astype(jnp.float32)


def fold_bn(bn, padded_c):
    """Eval-mode BatchNorm folded to per-channel scale/bias, shaped (1, Cp) f32."""
    scale = bn["gamma"] * lax.rsqrt(bn["var"] + EPS)
    bias = bn["beta"] - bn["mean"] * scale
    scale = _pad_axis(scale, padded_c, 0)
    bias = _pad_axis(bias, padded_c, 0)
    return scale[None, :].astype(jnp.float32), bias[None, :].astype(jnp.float32)


def _pick_row_tile(ho):
    """Largest 'nice' output-row tile that divides Ho and leaves >= 2 grid steps."""
    for th in (16, 8, 4, 2):
        if ho % th == 0 and ho // th >= 2:
            return th
    return ho


def make_tap_sources(x_nhwc, stride, Ho, Wo):
    """Phase-decomposed, zero-padded conv source slab (~1x the input bytes).

    Returns src of shape (N, stride**2, Ho+4, Wo+2, C) and 9 static taps
    (phase, dh, dw) such that for conv output pixel (i, j) and kernel tap
    (kh, kw):
        src[:, phase, 1 + i + dh, j + dw, :] == xpad[:, stride*i + kh, stride*j + kw, :]
    where xpad is x zero-padded by 1 on top/left (conv padding=1).  One extra
    zero row is added top/bottom so the fused kernel can read the +/-1 halo
    rows of any row tile without going out of bounds.
    """
    N, H, W, C = x_nhwc.shape
    Hs, Ws = Ho + 2, Wo + 2
    pad_b = stride * Hs - 1 - H
    pad_r = stride * Ws - 1 - W
    xp = jnp.pad(x_nhwc, ((0, 0), (1, pad_b), (1, pad_r), (0, 0)))
    phases = []
    for a in range(stride):
        for b in range(stride):
            phases.append(xp[:, a::stride, b::stride, :][:, :Hs, :Ws, :])
    src = jnp.stack(phases, axis=1)                               # (N, s*s, Hs, Ws, C)
    src = jnp.pad(src, ((0, 0), (0, 0), (1, 1), (0, 0), (0, 0)))  # halo rows

    taps = []
    for kh in range(3):
        for kw in range(3):
            taps.append(((kh % stride) * stride + (kw % stride),
                         kh // stride, kw // stride))
    return src, taps


# ---------------------------------------------------------------------------
# Fused kernel: conv1+BN1+ReLU (to VMEM slab) -> conv2+BN2 + shortcut + ReLU
# ---------------------------------------------------------------------------
def _make_fused_kernel(taps1, stride, Ho, Wo, TH, has_down):
    rows1 = TH + 2                      # conv1 rows per tile (incl. +/-1 halo)
    M1 = rows1 * Wo
    M2 = TH * Wo
    # Location of the stride-sampled input (shortcut source) inside the slab.
    ph_id = (1 % stride) * stride + (1 % stride)
    dh_id = 1 // stride + 1             # +1 for the extra zero row on top
    dw_id = 1 // stride

    def kernel(*refs):
        if has_down:
            (src_ref, w1_ref, s1_ref, b1_ref, w2_ref, s2_ref, b2_ref,
             wd_ref, sd_ref, bd_ref, o_ref, mid_ref) = refs
        else:
            (src_ref, w1_ref, s1_ref, b1_ref, w2_ref, s2_ref, b2_ref,
             o_ref, mid_ref) = refs

        cin = src_ref.shape[-1]
        pp = o_ref.shape[-1]
        r0 = pl.multiple_of(pl.program_id(1) * TH, TH)   # first output row of tile

        # ---- conv1 + BN1 + ReLU over TH+2 halo rows: K-packed single MXU dot
        wins = [src_ref[0, p, pl.ds(r0 + dh, rows1), dw:dw + Wo, :]
                for (p, dh, dw) in taps1]
        patch1 = jnp.concatenate(wins, axis=-1).reshape(M1, 9 * cin)
        y1 = jnp.dot(patch1, w1_ref[...], preferred_element_type=jnp.float32)
        y1 = jnp.maximum(y1 * s1_ref[...] + b1_ref[...], 0.0)
        y1 = y1.reshape(rows1, Wo, pp)
        # Halo rows outside the image must act as conv2's zero padding.
        g = lax.broadcasted_iota(jnp.int32, (rows1, Wo, pp), 0) + (r0 - 1)
        y1 = jnp.where((g >= 0) & (g < Ho), y1, 0.0)

        # Stage into the bf16 VMEM slab (zero left/right border columns).
        zcol = jnp.zeros((rows1, 1, pp), mid_ref.dtype)
        mid_ref[:, 0:1, :] = zcol
        mid_ref[:, Wo + 1:Wo + 2, :] = zcol
        mid_ref[:, 1:Wo + 1, :] = y1.astype(mid_ref.dtype)

        # ---- conv2 + BN2 over the TH output rows: K-packed single MXU dot ----
        wins2 = [mid_ref[kh:kh + TH, kw:kw + Wo, :]
                 for kh in range(3) for kw in range(3)]
        patch2 = jnp.concatenate(wins2, axis=-1).reshape(M2, 9 * pp)
        y2 = jnp.dot(patch2, w2_ref[...], preferred_element_type=jnp.float32)
        y2 = y2 * s2_ref[...] + b2_ref[...]

        # ---- shortcut: plain VPU add (identity) or fused 1x1 conv + BN ------
        xid = src_ref[0, ph_id, pl.ds(r0 + dh_id, TH), dw_id:dw_id + Wo, :]
        if has_down:
            ident = jnp.dot(xid.reshape(M2, cin), wd_ref[...],
                            preferred_element_type=jnp.float32)
            y2 = y2 + ident * sd_ref[...] + bd_ref[...]
        else:
            y2 = y2 + xid.reshape(M2, pp).astype(jnp.float32)

        o_ref[0] = jnp.maximum(y2, 0.0).reshape(TH, Wo, pp).astype(o_ref.dtype)

    return kernel


def _fused_block_call(src, w1, s1, b1, w2, s2, b2, down, taps1, stride,
                      Ho, Wo, TH, out_dtype):
    N, nph, Hs, Ws, Cin_p = src.shape
    Pp = w1.shape[-1]
    n_rt = Ho // TH

    in_specs = [
        pl.BlockSpec((1, nph, Hs, Ws, Cin_p), lambda n, r: (n, 0, 0, 0, 0)),
        pl.BlockSpec((9 * Cin_p, Pp), lambda n, r: (0, 0)),
        pl.BlockSpec((1, Pp), lambda n, r: (0, 0)),
        pl.BlockSpec((1, Pp), lambda n, r: (0, 0)),
        pl.BlockSpec((9 * Pp, Pp), lambda n, r: (0, 0)),
        pl.BlockSpec((1, Pp), lambda n, r: (0, 0)),
        pl.BlockSpec((1, Pp), lambda n, r: (0, 0)),
    ]
    args = [src, w1, s1, b1, w2, s2, b2]
    flops = 2 * N * Ho * Wo * Pp * (9 * Cin_p + 9 * Pp)
    if down is not None:
        wd, sd, bd = down
        in_specs += [
            pl.BlockSpec((Cin_p, Pp), lambda n, r: (0, 0)),
            pl.BlockSpec((1, Pp), lambda n, r: (0, 0)),
            pl.BlockSpec((1, Pp), lambda n, r: (0, 0)),
        ]
        args += [wd, sd, bd]
        flops += 2 * N * Ho * Wo * Cin_p * Pp

    bytes_accessed = int(sum(a.size * a.dtype.itemsize for a in args)
                         + N * Ho * Wo * Pp * jnp.dtype(out_dtype).itemsize)

    kernel = _make_fused_kernel(taps1, stride, Ho, Wo, TH, down is not None)

    return pl.pallas_call(
        kernel,
        out_shape=jax.ShapeDtypeStruct((N, Ho, Wo, Pp), out_dtype),
        grid=(N, n_rt),
        in_specs=in_specs,
        out_specs=pl.BlockSpec((1, TH, Wo, Pp), lambda n, r: (n, r, 0, 0)),
        scratch_shapes=[pltpu.VMEM((TH + 2, Wo + 2, Pp), jnp.bfloat16)],
        compiler_params=pltpu.CompilerParams(
            dimension_semantics=("parallel", "parallel"),
            vmem_limit_bytes=48 * 1024 * 1024),
        cost_estimate=pl.CostEstimate(flops=int(flops), transcendentals=0,
                                      bytes_accessed=bytes_accessed),
    )(*args)


# ---------------------------------------------------------------------------
# BasicBlock forward (public wrapper, NCHW in / NCHW out like PyTorch)
# ---------------------------------------------------------------------------
def basic_block_forward(x_nchw, params, stride):
    x = jnp.transpose(x_nchw, (0, 2, 3, 1))                 # NCHW -> NHWC
    N, H, W, cin = x.shape
    planes = params["w1"].shape[-1]
    Cin_p = _round_up(cin, LANE)                             # lane-dense contraction
    Pp = _round_up(planes, LANE)                             # lane-dense output channels
    Ho = (H + 2 - 3) // stride + 1
    Wo = (W + 2 - 3) // stride + 1
    TH = _pick_row_tile(Ho)

    xb = _pad_axis(x.astype(jnp.bfloat16), Cin_p, axis=3)
    src, taps = make_tap_sources(xb, stride, Ho, Wo)         # (N, s*s, Ho+4, Wo+2, Cin_p)

    w1 = _pad_axis(_pad_axis(params["w1"], Cin_p, 2), Pp, 3)
    w1 = w1.reshape(9 * Cin_p, Pp).astype(jnp.bfloat16)
    s1, b1 = fold_bn(params["bn1"], Pp)
    w2 = _pad_axis(_pad_axis(params["w2"], Pp, 2), Pp, 3)
    w2 = w2.reshape(9 * Pp, Pp).astype(jnp.bfloat16)
    s2, b2 = fold_bn(params["bn2"], Pp)

    down = None
    if stride != 1 or cin != planes:
        wd = _pad_axis(_pad_axis(params["wd"], Cin_p, 0), Pp, 1).astype(jnp.bfloat16)
        sd, bd = fold_bn(params["bnd"], Pp)
        down = (wd, sd, bd)

    out = _fused_block_call(src, w1, s1, b1, w2, s2, b2, down, taps, stride,
                            Ho, Wo, TH, out_dtype=jnp.bfloat16)  # (N, Ho, Wo, Pp)
    out = out[..., :planes].astype(jnp.float32)
    return jnp.transpose(out, (0, 3, 1, 2))                  # back to NCHW


# ---------------------------------------------------------------------------
# Pure-JAX reference (bf16-rounded operands to mirror kernel precision)
# ---------------------------------------------------------------------------
def basic_block_reference(x_nchw, params, stride):
    x = _q(jnp.transpose(x_nchw, (0, 2, 3, 1)).astype(jnp.float32))
    cin = x.shape[-1]
    planes = params["w1"].shape[-1]

    def conv(y, w, s, pad):
        return lax.conv_general_dilated(
            y, w, (s, s), pad, dimension_numbers=("NHWC", "HWIO", "NHWC"),
            precision=lax.Precision.HIGHEST)

    def bn(y, p):
        sc = p["gamma"] * lax.rsqrt(p["var"] + EPS)
        bi = p["beta"] - p["mean"] * sc
        return y * sc + bi

    out = jax.nn.relu(bn(conv(x, _q(params["w1"]), stride, ((1, 1), (1, 1))),
                         params["bn1"]))
    out = _q(out)   # kernel stages the conv1 output in bf16 VMEM
    out = bn(conv(out, _q(params["w2"]), 1, ((1, 1), (1, 1))), params["bn2"])
    if stride != 1 or cin != planes:
        ident = bn(conv(x, _q(params["wd"]).reshape(1, 1, cin, planes), stride,
                        ((0, 0), (0, 0))), params["bnd"])
    else:
        ident = x
    out = _q(jax.nn.relu(out + ident))   # kernel writes bf16
    return jnp.transpose(out, (0, 3, 1, 2))


# ---------------------------------------------------------------------------
# Deterministic synthetic parameters (mirrors the module __init__ shapes)
# ---------------------------------------------------------------------------
def init_params(key, in_planes, planes, stride):
    keys = jax.random.split(key, 12)

    def bn_params(k0, k1, k2, k3, c):
        return {
            "gamma": jax.random.uniform(k0, (c,), jnp.float32, 0.5, 1.5),
            "beta": 0.1 * jax.random.normal(k1, (c,), jnp.float32),
            "mean": 0.1 * jax.random.normal(k2, (c,), jnp.float32),
            "var": jax.random.uniform(k3, (c,), jnp.float32, 0.5, 1.5),
        }

    params = {
        # weights stored HWIO (3,3,Cin,Cout) — equiv. to torch (Cout,Cin,3,3)
        "w1": 0.1 * jax.random.normal(keys[0], (3, 3, in_planes, planes), jnp.float32),
        "w2": 0.1 * jax.random.normal(keys[1], (3, 3, planes, planes), jnp.float32),
        "bn1": bn_params(keys[2], keys[3], keys[4], keys[5], planes),
        "bn2": bn_params(keys[6], keys[7], keys[8], keys[9], planes),
    }
    if stride != 1 or in_planes != planes:
        params["wd"] = 0.1 * jax.random.normal(keys[10], (in_planes, planes), jnp.float32)
        params["bnd"] = bn_params(*jax.random.split(keys[11], 4), planes)
    return params


if __name__ == "__main__":
    key = jax.random.PRNGKey(0)

    configs = [
        # (N, in_planes, planes, H, W, stride)
        (2, 4, 8, 16, 16, 2),   # stride-2 downsample shortcut (1x1 conv + BN)
        (2, 8, 8, 16, 16, 1),   # identity shortcut (plain VPU add)
        (2, 4, 8, 16, 16, 1),   # stride-1 downsample (channel expansion)
    ]
    for idx, (N, cin, planes, H, W, stride) in enumerate(configs):
        k_x, k_p = jax.random.split(jax.random.fold_in(key, idx))
        x = jax.random.normal(k_x, (N, cin, H, W), jnp.float32)   # NCHW like PyTorch
        params = init_params(k_p, cin, planes, stride)

        fwd = jax.jit(functools.partial(basic_block_forward, stride=stride))
        out = fwd(x, params)
        jax.block_until_ready(out)

        ref = basic_block_reference(x, params, stride)
        Ho = (H + 2 - 3) // stride + 1
        Wo = (W + 2 - 3) // stride + 1
        assert out.shape == (N, planes, Ho, Wo), out.shape
        max_err = float(jnp.max(jnp.abs(out - ref)))
        assert jnp.allclose(out, ref, atol=5e-3, rtol=5e-3), (
            "mismatch vs reference", idx, max_err)

    print("KERNEL_OK")
</pallas_src>

<mosaic_0001>
module attributes {stable_mosaic.version = 11 : i64} {
  func.func @kernel(%arg0: i32, %arg1: i32, %arg2: memref<1x4x12x10x128xbf16, #tpu.memory_space<vmem>>, %arg3: memref<1152x128xbf16, #tpu.memory_space<vmem>>, %arg4: memref<1x128xf32, #tpu.memory_space<vmem>>, %arg5: memref<1x128xf32, #tpu.memory_space<vmem>>, %arg6: memref<1152x128xbf16, #tpu.memory_space<vmem>>, %arg7: memref<1x128xf32, #tpu.memory_space<vmem>>, %arg8: memref<1x128xf32, #tpu.memory_space<vmem>>, %arg9: memref<128x128xbf16, #tpu.memory_space<vmem>>, %arg10: memref<1x128xf32, #tpu.memory_space<vmem>>, %arg11: memref<1x128xf32, #tpu.memory_space<vmem>>, %arg12: memref<1x4x8x128xbf16, #tpu.memory_space<vmem>>, %arg13: memref<6x10x128xbf16, #tpu.memory_space<vmem>>) attributes {dimension_semantics = [#tpu.dimension_semantics<parallel>, #tpu.dimension_semantics<parallel>], iteration_bounds = array<i64: 2, 2>, scalar_prefetch = 0 : i64, scratch_operands = 1 : i64, tpu.core_type = #tpu.core_type<tc>, window_params = [{transform_indices = @transform_0, window_bounds = array<i64: 1, 4, 12, 10, 128>}, {pipeline_mode = #tpu.pipeline_mode<synchronous>, transform_indices = @transform_1, window_bounds = array<i64: 1152, 128>}, {pipeline_mode = #tpu.pipeline_mode<synchronous>, transform_indices = @transform_2, window_bounds = array<i64: 1, 128>}, {pipeline_mode = #tpu.pipeline_mode<synchronous>, transform_indices = @transform_3, window_bounds = array<i64: 1, 128>}, {pipeline_mode = #tpu.pipeline_mode<synchronous>, transform_indices = @transform_4, window_bounds = array<i64: 1152, 128>}, {pipeline_mode = #tpu.pipeline_mode<synchronous>, transform_indices = @transform_5, window_bounds = array<i64: 1, 128>}, {pipeline_mode = #tpu.pipeline_mode<synchronous>, transform_indices = @transform_6, window_bounds = array<i64: 1, 128>}, {pipeline_mode = #tpu.pipeline_mode<synchronous>, transform_indices = @transform_7, window_bounds = array<i64: 128, 128>}, {pipeline_mode = #tpu.pipeline_mode<synchronous>, transform_indices = @transform_8, window_bounds = array<i64: 1, 128>}, {pipeline_mode = #tpu.pipeline_mode<synchronous>, transform_indices = @transform_9, window_bounds = array<i64: 1, 128>}, {transform_indices = @transform_10, window_bounds = array<i64: 1, 4, 8, 128>}]} {
    %c4_i32 = arith.constant 4 : i32
    %0 = arith.muli %arg1, %c4_i32 : i32
    %1 = tpu.assume_multiple %0, 4 : i32
    %c0_i32 = arith.constant 0 : i32
    %2 = arith.addi %1, %c0_i32 : i32
    %c0 = arith.constant 0 : index
    %c0_0 = arith.constant 0 : index
    %3 = arith.index_cast %2 : i32 to index
    %c0_1 = arith.constant 0 : index
    %c0_2 = arith.constant 0 : index
    %4 = vector.load %arg2[%c0, %c0_0, %3, %c0_1, %c0_2] : memref<1x4x12x10x128xbf16, #tpu.memory_space<vmem>>, vector<1x1x6x8x128xbf16>
    %5 = vector.shape_cast %4 : vector<1x1x6x8x128xbf16> to vector<6x8x128xbf16>
    %c0_i32_3 = arith.constant 0 : i32
    %6 = arith.addi %1, %c0_i32_3 : i32
    %c0_4 = arith.constant 0 : index
    %c1 = arith.constant 1 : index
    %7 = arith.index_cast %6 : i32 to index
    %c0_5 = arith.constant 0 : index
    %c0_6 = arith.constant 0 : index
    %8 = vector.load %arg2[%c0_4, %c1, %7, %c0_5, %c0_6] : memref<1x4x12x10x128xbf16, #tpu.memory_space<vmem>>, vector<1x1x6x8x128xbf16>
    %9 = vector.shape_cast %8 : vector<1x1x6x8x128xbf16> to vector<6x8x128xbf16>
    %c0_i32_7 = arith.constant 0 : i32
    %10 = arith.addi %1, %c0_i32_7 : i32
    %c0_8 = arith.constant 0 : index
    %c0_9 = arith.constant 0 : index
    %11 = arith.index_cast %10 : i32 to index
    %c1_10 = arith.constant 1 : index
    %c0_11 = arith.constant 0 : index
    %12 = vector.load %arg2[%c0_8, %c0_9, %11, %c1_10, %c0_11] : memref<1x4x12x10x128xbf16, #tpu.memory_space<vmem>>, vector<1x1x6x8x128xbf16>
    %13 = vector.shape_cast %12 : vector<1x1x6x8x128xbf16> to vector<6x8x128xbf16>
    %c0_i32_12 = arith.constant 0 : i32
    %14 = arith.addi %1, %c0_i32_12 : i32
    %c0_13 = arith.constant 0 : index
    %c2 = arith.constant 2 : index
    %15 = arith.index_cast %14 : i32 to index
    %c0_14 = arith.constant 0 : index
    %c0_15 = arith.constant 0 : index
    %16 = vector.load %arg2[%c0_13, %c2, %15, %c0_14, %c0_15] : memref<1x4x12x10x128xbf16, #tpu.memory_space<vmem>>, vector<1x1x6x8x128xbf16>
    %17 = vector.shape_cast %16 : vector<1x1x6x8x128xbf16> to vector<6x8x128xbf16>
    %c0_i32_16 = arith.constant 0 : i32
    %18 = arith.addi %1, %c0_i32_16 : i32
    %c0_17 = arith.constant 0 : index
    %c3 = arith.constant 3 : index
    %19 = arith.index_cast %18 : i32 to index
    %c0_18 = arith.constant 0 : index
    %c0_19 = arith.constant 0 : index
    %20 = vector.load %arg2[%c0_17, %c3, %19, %c0_18, %c0_19] : memref<1x4x12x10x128xbf16, #tpu.memory_space<vmem>>, vector<1x1x6x8x128xbf16>
    %21 = vector.shape_cast %20 : vector<1x1x6x8x128xbf16> to vector<6x8x128xbf16>
    %c0_i32_20 = arith.constant 0 : i32
    %22 = arith.addi %1, %c0_i32_20 : i32
    %c0_21 = arith.constant 0 : index
    %c2_22 = arith.constant 2 : index
    %23 = arith.index_cast %22 : i32 to index
    %c1_23 = arith.constant 1 : index
    %c0_24 = arith.constant 0 : index
    %24 = vector.load %arg2[%c0_21, %c2_22, %23, %c1_23, %c0_24] : memref<1x4x12x10x128xbf16, #tpu.memory_space<vmem>>, vector<1x1x6x8x128xbf16>
    %25 = vector.shape_cast %24 : vector<1x1x6x8x128xbf16> to vector<6x8x128xbf16>
    %c1_i32 = arith.constant 1 : i32
    %26 = arith.addi %1, %c1_i32 : i32
    %c0_25 = arith.constant 0 : index
    %c0_26 = arith.constant 0 : index
    %27 = arith.index_cast %26 : i32 to index
    %c0_27 = arith.constant 0 : index
    %c0_28 = arith.constant 0 : index
    %28 = vector.load %arg2[%c0_25, %c0_26, %27, %c0_27, %c0_28] : memref<1x4x12x10x128xbf16, #tpu.memory_space<vmem>>, vector<1x1x6x8x128xbf16>
    %29 = vector.shape_cast %28 : vector<1x1x6x8x128xbf16> to vector<6x8x128xbf16>
    %c1_i32_29 = arith.constant 1 : i32
    %30 = arith.addi %1, %c1_i32_29 : i32
    %c0_30 = arith.constant 0 : index
    %c1_31 = arith.constant 1 : index
    %31 = arith.index_cast %30 : i32 to index
    %c0_32 = arith.constant 0 : index
    %c0_33 = arith.constant 0 : index
    %32 = vector.load %arg2[%c0_30, %c1_31, %31, %c0_32, %c0_33] : memref<1x4x12x10x128xbf16, #tpu.memory_space<vmem>>, vector<1x1x6x8x128xbf16>
    %33 = vector.shape_cast %32 : vector<1x1x6x8x128xbf16> to vector<6x8x128xbf16>
    %c1_i32_34 = arith.constant 1 : i32
    %34 = arith.addi %1, %c1_i32_34 : i32
    %c0_35 = arith.constant 0 : index
    %c0_36 = arith.constant 0 : index
    %35 = arith.index_cast %34 : i32 to index
    %c1_37 = arith.constant 1 : index
    %c0_38 = arith.constant 0 : index
    %36 = vector.load %arg2[%c0_35, %c0_36, %35, %c1_37, %c0_38] : memref<1x4x12x10x128xbf16, #tpu.memory_space<vmem>>, vector<1x1x6x8x128xbf16>
    %37 = vector.shape_cast %36 : vector<1x1x6x8x128xbf16> to vector<6x8x128xbf16>
    %38 = tpu.concatenate %5, %9, %13, %17, %21, %25, %29, %33, %37 in 2 : vector<6x8x128xbf16>, vector<6x8x128xbf16>, vector<6x8x128xbf16>, vector<6x8x128xbf16>, vector<6x8x128xbf16>, vector<6x8x128xbf16>, vector<6x8x128xbf16>, vector<6x8x128xbf16>, vector<6x8x128xbf16> -> vector<6x8x1152xbf16>
    %39 = vector.shape_cast %38 : vector<6x8x1152xbf16> to vector<48x1152xbf16>
    %c0_39 = arith.constant 0 : index
    %c0_40 = arith.constant 0 : index
    %40 = vector.load %arg3[%c0_39, %c0_40] : memref<1152x128xbf16, #tpu.memory_space<vmem>>, vector<1152x128xbf16>
    %cst = arith.constant dense<0.000000e+00> : vector<48x128xf32>
    %41 = tpu.matmul %39, %40, %cst {dimension_numbers = #tpu.dot_dimension_numbers<[1], [0], [0], [1], [0, 0, 1, 1], [], []>} : vector<48x1152xbf16>, vector<1152x128xbf16>, vector<48x128xf32> -> vector<48x128xf32>
    %c0_41 = arith.constant 0 : index
    %c0_42 = arith.constant 0 : index
    %42 = vector.load %arg4[%c0_41, %c0_42] : memref<1x128xf32, #tpu.memory_space<vmem>>, vector<1x128xf32>
    %43 = vector.broadcast %42 : vector<1x128xf32> to vector<48x128xf32>
    %44 = arith.mulf %41, %43 : vector<48x128xf32>
    %c0_43 = arith.constant 0 : index
    %c0_44 = arith.constant 0 : index
    %45 = vector.load %arg5[%c0_43, %c0_44] : memref<1x128xf32, #tpu.memory_space<vmem>>, vector<1x128xf32>
    %46 = vector.broadcast %45 : vector<1x128xf32> to vector<48x128xf32>
    %47 = arith.addf %44, %46 : vector<48x128xf32>
    %cst_45 = arith.constant 0.000000e+00 : f32
    %48 = vector.broadcast %cst_45 : f32 to vector<48x128xf32>
    %49 = arith.maximumf %47, %48 : vector<48x128xf32>
    %50 = vector.shape_cast %49 : vector<48x128xf32> to vector<6x8x128xf32>
    %51 = tpu.iota {dimensions = array<i32: 0>} : vector<6x8x128xi32>
    %c1_i32_46 = arith.constant 1 : i32
    %52 = arith.subi %1, %c1_i32_46 : i32
    %53 = vector.broadcast %52 : i32 to vector<6x8x128xi32>
    %54 = arith.addi %51, %53 : vector<6x8x128xi32>
    %c0_i32_47 = arith.constant 0 : i32
    %55 = vector.broadcast %c0_i32_47 : i32 to vector<6x8x128xi32>
    %56 = arith.cmpi sge, %54, %55 : vector<6x8x128xi32>
    %c8_i32 = arith.constant 8 : i32
    %57 = vector.broadcast %c8_i32 : i32 to vector<6x8x128xi32>
    %58 = arith.cmpi slt, %54, %57 : vector<6x8x128xi32>
    %59 = arith.andi %56, %58 : vector<6x8x128xi1>
    %cst_48 = arith.constant 0.000000e+00 : f32
    %60 = vector.broadcast %cst_48 : f32 to vector<6x8x128xf32>
    %61 = arith.select %59, %50, %60 : vector<6x8x128xi1>, vector<6x8x128xf32>
    %cst_49 = arith.constant 0.000000e+00 : bf16
    %62 = vector.broadcast %cst_49 : bf16 to vector<6x1x128xbf16>
    %c0_50 = arith.constant 0 : index
    %c0_51 = arith.constant 0 : index
    %c0_52 = arith.constant 0 : index
    %63 = vector.load %arg13[%c0_50, %c0_51, %c0_52] : memref<6x10x128xbf16, #tpu.memory_space<vmem>>, vector<6x1x128xbf16>
    tpu.vector_store %arg13[%c0_50, %c0_51, %c0_52], %62 {strides = array<i32>} : memref<6x10x128xbf16, #tpu.memory_space<vmem>>, vector<6x1x128xbf16>,
    %c0_53 = arith.constant 0 : index
    %c9 = arith.constant 9 : index
    %c0_54 = arith.constant 0 : index
    %64 = vector.load %arg13[%c0_53, %c9, %c0_54] : memref<6x10x128xbf16, #tpu.memory_space<vmem>>, vector<6x1x128xbf16>
    tpu.vector_store %arg13[%c0_53, %c9, %c0_54], %62 {strides = array<i32>} : memref<6x10x128xbf16, #tpu.memory_space<vmem>>, vector<6x1x128xbf16>,
    %65 = arith.truncf %61 : vector<6x8x128xf32> to vector<6x8x128xbf16>
    %c0_55 = arith.constant 0 : index
    %c1_56 = arith.constant 1 : index
    %c0_57 = arith.constant 0 : index
    %66 = vector.load %arg13[%c0_55, %c1_56, %c0_57] : memref<6x10x128xbf16, #tpu.memory_space<vmem>>, vector<6x8x128xbf16>
    tpu.vector_store %arg13[%c0_55, %c1_56, %c0_57], %65 {strides = array<i32>} : memref<6x10x128xbf16, #tpu.memory_space<vmem>>, vector<6x8x128xbf16>,
    %c0_58 = arith.constant 0 : index
    %c0_59 = arith.constant 0 : index
    %c0_60 = arith.constant 0 : index
    %67 = vector.load %arg13[%c0_58, %c0_59, %c0_60] : memref<6x10x128xbf16, #tpu.memory_space<vmem>>, vector<4x8x128xbf16>
    %c0_61 = arith.constant 0 : index
    %c1_62 = arith.constant 1 : index
    %c0_63 = arith.constant 0 : index
    %68 = vector.load %arg13[%c0_61, %c1_62, %c0_63] : memref<6x10x128xbf16, #tpu.memory_space<vmem>>, vector<4x8x128xbf16>
    %c0_64 = arith.constant 0 : index
    %c2_65 = arith.constant 2 : index
    %c0_66 = arith.constant 0 : index
    %69 = vector.load %arg13[%c0_64, %c2_65, %c0_66] : memref<6x10x128xbf16, #tpu.memory_space<vmem>>, vector<4x8x128xbf16>
    %c1_67 = arith.constant 1 : index
    %c0_68 = arith.constant 0 : index
    %c0_69 = arith.constant 0 : index
    %70 = vector.load %arg13[%c1_67, %c0_68, %c0_69] : memref<6x10x128xbf16, #tpu.memory_space<vmem>>, vector<4x8x128xbf16>
    %c1_70 = arith.constant 1 : index
    %c1_71 = arith.constant 1 : index
    %c0_72 = arith.constant 0 : index
    %71 = vector.load %arg13[%c1_70, %c1_71, %c0_72] : memref<6x10x128xbf16, #tpu.memory_space<vmem>>, vector<4x8x128xbf16>
    %c1_73 = arith.constant 1 : index
    %c2_74 = arith.constant 2 : index
    %c0_75 = arith.constant 0 : index
    %72 = vector.load %arg13[%c1_73, %c2_74, %c0_75] : memref<6x10x128xbf16, #tpu.memory_space<vmem>>, vector<4x8x128xbf16>
    %c2_76 = arith.constant 2 : index
    %c0_77 = arith.constant 0 : index
    %c0_78 = arith.constant 0 : index
    %73 = vector.load %arg13[%c2_76, %c0_77, %c0_78] : memref<6x10x128xbf16, #tpu.memory_space<vmem>>, vector<4x8x128xbf16>
    %c2_79 = arith.constant 2 : index
    %c1_80 = arith.constant 1 : index
    %c0_81 = arith.constant 0 : index
    %74 = vector.load %arg13[%c2_79, %c1_80, %c0_81] : memref<6x10x128xbf16, #tpu.memory_space<vmem>>, vector<4x8x128xbf16>
    %c2_82 = arith.constant 2 : index
    %c2_83 = arith.constant 2 : index
    %c0_84 = arith.constant 0 : index
    %75 = vector.load %arg13[%c2_82, %c2_83, %c0_84] : memref<6x10x128xbf16, #tpu.memory_space<vmem>>, vector<4x8x128xbf16>
    %76 = tpu.concatenate %67, %68, %69, %70, %71, %72, %73, %74, %75 in 2 : vector<4x8x128xbf16>, vector<4x8x128xbf16>, vector<4x8x128xbf16>, vector<4x8x128xbf16>, vector<4x8x128xbf16>, vector<4x8x128xbf16>, vector<4x8x128xbf16>, vector<4x8x128xbf16>, vector<4x8x128xbf16> -> vector<4x8x1152xbf16>
    %77 = vector.shape_cast %76 : vector<4x8x1152xbf16> to vector<32x1152xbf16>
    %c0_85 = arith.constant 0 : index
    %c0_86 = arith.constant 0 : index
    %78 = vector.load %arg6[%c0_85, %c0_86] : memref<1152x128xbf16, #tpu.memory_space<vmem>>, vector<1152x128xbf16>
    %cst_87 = arith.constant dense<0.000000e+00> : vector<32x128xf32>
    %79 = tpu.matmul %77, %78, %cst_87 {dimension_numbers = #tpu.dot_dimension_numbers<[1], [0], [0], [1], [0, 0, 1, 1], [], []>} : vector<32x1152xbf16>, vector<1152x128xbf16>, vector<32x128xf32> -> vector<32x128xf32>
    %c0_88 = arith.constant 0 : index
    %c0_89 = arith.constant 0 : index
    %80 = vector.load %arg7[%c0_88, %c0_89] : memref<1x128xf32, #tpu.memory_space<vmem>>, vector<1x128xf32>
    %81 = vector.broadcast %80 : vector<1x128xf32> to vector<32x128xf32>
    %82 = arith.mulf %79, %81 : vector<32x128xf32>
    %c0_90 = arith.constant 0 : index
    %c0_91 = arith.constant 0 : index
    %83 = vector.load %arg8[%c0_90, %c0_91] : memref<1x128xf32, #tpu.memory_space<vmem>>, vector<1x128xf32>
    %84 = vector.broadcast %83 : vector<1x128xf32> to vector<32x128xf32>
    %85 = arith.addf %82, %84 : vector<32x128xf32>
    %c1_i32_92 = arith.constant 1 : i32
    %86 = arith.addi %1, %c1_i32_92 : i32
    %c0_93 = arith.constant 0 : index
    %c3_94 = arith.constant 3 : index
    %87 = arith.index_cast %86 : i32 to index
    %c0_95 = arith.constant 0 : index
    %c0_96 = arith.constant 0 : index
    %88 = vector.load %arg2[%c0_93, %c3_94, %87, %c0_95, %c0_96] : memref<1x4x12x10x128xbf16, #tpu.memory_space<vmem>>, vector<1x1x4x8x128xbf16>
    %89 = vector.shape_cast %88 : vector<1x1x4x8x128xbf16> to vector<4x8x128xbf16>
    %90 = vector.shape_cast %89 : vector<4x8x128xbf16> to vector<32x128xbf16>
    %c0_97 = arith.constant 0 : index
    %c0_98 = arith.constant 0 : index
    %91 = vector.load %arg9[%c0_97, %c0_98] : memref<128x128xbf16, #tpu.memory_space<vmem>>, vector<128x128xbf16>
    %cst_99 = arith.constant dense<0.000000e+00> : vector<32x128xf32>
    %92 = tpu.matmul %90, %91, %cst_99 {dimension_numbers = #tpu.dot_dimension_numbers<[1], [0], [0], [1], [0, 0, 1, 1], [], []>} : vector<32x128xbf16>, vector<128x128xbf16>, vector<32x128xf32> -> vector<32x128xf32>
    %c0_100 = arith.constant 0 : index
    %c0_101 = arith.constant 0 : index
    %93 = vector.load %arg10[%c0_100, %c0_101] : memref<1x128xf32, #tpu.memory_space<vmem>>, vector<1x128xf32>
    %94 = vector.broadcast %93 : vector<1x128xf32> to vector<32x128xf32>
    %95 = arith.mulf %92, %94 : vector<32x128xf32>
    %96 = arith.addf %85, %95 : vector<32x128xf32>
    %c0_102 = arith.constant 0 : index
    %c0_103 = arith.constant 0 : index
    %97 = vector.load %arg11[%c0_102, %c0_103] : memref<1x128xf32, #tpu.memory_space<vmem>>, vector<1x128xf32>
    %98 = vector.broadcast %97 : vector<1x128xf32> to vector<32x128xf32>
    %99 = arith.addf %96, %98 : vector<32x128xf32>
    %cst_104 = arith.constant 0.000000e+00 : f32
    %100 = vector.broadcast %cst_104 : f32 to vector<32x128xf32>
    %101 = arith.maximumf %99, %100 : vector<32x128xf32>
    %102 = vector.shape_cast %101 : vector<32x128xf32> to vector<4x8x128xf32>
    %103 = arith.truncf %102 : vector<4x8x128xf32> to vector<4x8x128xbf16>
    %c0_105 = arith.constant 0 : index
    %c0_106 = arith.constant 0 : index
    %c0_107 = arith.constant 0 : index
    %c0_108 = arith.constant 0 : index
    %104 = vector.load %arg12[%c0_105, %c0_106, %c0_107, %c0_108] : memref<1x4x8x128xbf16, #tpu.memory_space<vmem>>, vector<1x4x8x128xbf16>
    %105 = vector.shape_cast %104 : vector<1x4x8x128xbf16> to vector<4x8x128xbf16>
    %106 = vector.shape_cast %103 : vector<4x8x128xbf16> to vector<1x4x8x128xbf16>
    tpu.vector_store %arg12[%c0_105, %c0_106, %c0_107, %c0_108], %106 {strides = array<i32>} : memref<1x4x8x128xbf16, #tpu.memory_space<vmem>>, vector<1x4x8x128xbf16>,
    return
  }
  func.func @transform_0(%arg0: i32, %arg1: i32) -> (i32, i32, i32, i32, i32) {
    %c0_i32 = arith.constant 0 : i32
    %c0_i32_0 = arith.constant 0 : i32
    %c0_i32_1 = arith.constant 0 : i32
    %c0_i32_2 = arith.constant 0 : i32
    %c0_i32_3 = arith.constant 0 : i32
    return %arg0, %c0_i32, %c0_i32_0, %c0_i32_1, %c0_i32_2 : i32, i32, i32, i32, i32
  }
  func.func @transform_1(%arg0: i32, %arg1: i32) -> (i32, i32) {
    %c0_i32 = arith.constant 0 : i32
    %c0_i32_0 = arith.constant 0 : i32
    %c0_i32_1 = arith.constant 0 : i32
    return %c0_i32, %c0_i32_0 : i32, i32
  }
  func.func @transform_2(%arg0: i32, %arg1: i32) -> (i32, i32) {
    %c0_i32 = arith.constant 0 : i32
    %c0_i32_0 = arith.constant 0 : i32
    %c0_i32_1 = arith.constant 0 : i32
    return %c0_i32, %c0_i32_0 : i32, i32
  }
  func.func @transform_3(%arg0: i32, %arg1: i32) -> (i32, i32) {
    %c0_i32 = arith.constant 0 : i32
    %c0_i32_0 = arith.constant 0 : i32
    %c0_i32_1 = arith.constant 0 : i32
    return %c0_i32, %c0_i32_0 : i32, i32
  }
  func.func @transform_4(%arg0: i32, %arg1: i32) -> (i32, i32) {
    %c0_i32 = arith.constant 0 : i32
    %c0_i32_0 = arith.constant 0 : i32
    %c0_i32_1 = arith.constant 0 : i32
    return %c0_i32, %c0_i32_0 : i32, i32
  }
  func.func @transform_5(%arg0: i32, %arg1: i32) -> (i32, i32) {
    %c0_i32 = arith.constant 0 : i32
    %c0_i32_0 = arith.constant 0 : i32
    %c0_i32_1 = arith.constant 0 : i32
    return %c0_i32, %c0_i32_0 : i32, i32
  }
  func.func @transform_6(%arg0: i32, %arg1: i32) -> (i32, i32) {
    %c0_i32 = arith.constant 0 : i32
    %c0_i32_0 = arith.constant 0 : i32
    %c0_i32_1 = arith.constant 0 : i32
    return %c0_i32, %c0_i32_0 : i32, i32
  }
  func.func @transform_7(%arg0: i32, %arg1: i32) -> (i32, i32) {
    %c0_i32 = arith.constant 0 : i32
    %c0_i32_0 = arith.constant 0 : i32
    %c0_i32_1 = arith.constant 0 : i32
    return %c0_i32, %c0_i32_0 : i32, i32
  }
  func.func @transform_8(%arg0: i32, %arg1: i32) -> (i32, i32) {
    %c0_i32 = arith.constant 0 : i32
    %c0_i32_0 = arith.constant 0 : i32
    %c0_i32_1 = arith.constant 0 : i32
    return %c0_i32, %c0_i32_0 : i32, i32
  }
  func.func @transform_9(%arg0: i32, %arg1: i32) -> (i32, i32) {
    %c0_i32 = arith.constant 0 : i32
    %c0_i32_0 = arith.constant 0 : i32
    %c0_i32_1 = arith.constant 0 : i32
    return %c0_i32, %c0_i32_0 : i32, i32
  }
  func.func @transform_10(%arg0: i32, %arg1: i32) -> (i32, i32, i32, i32) {
    %c0_i32 = arith.constant 0 : i32
    %c0_i32_0 = arith.constant 0 : i32
    %c0_i32_1 = arith.constant 0 : i32
    return %arg0, %arg1, %c0_i32, %c0_i32_0 : i32, i32, i32, i32
  }
}

</mosaic_0001>

<bundles_post_ra>
// kernel: basic_block_forward.1
= control target key start
LH: loop header
LB: loop body
LE: loop exit
PB: predicated region body
PF: predicated region fallthrough
CT: control target
= control target key end

     0   :  { %s4128_s13 = smov 0   ;;  %s4130_s14 = smov 0   ;;  %s5095_s0 = inlined_call_operand.vmem [shape: bf16[2,4,12,10,128], index: 0, kind: input, shape index: {}]   ;;  %s5096_s1 = inlined_call_operand.vmem [shape: bf16[1152,128], index: 1, kind: input, shape index: {}]   ;;  %s5097_s2 = inlined_call_operand.vmem [shape: f32[1,128], index: 2, kind: input, shape index: {}]   ;;  %s5098_s3 = inlined_call_operand.vmem [shape: f32[1,128], index: 3, kind: input, shape index: {}]   ;;  %s5099_s4 = inlined_call_operand.vmem [shape: bf16[1152,128], index: 4, kind: input, shape index: {}]   ;;  %s5100_s5 = inlined_call_operand.vmem [shape: f32[1,128], index: 5, kind: input, shape index: {}]   ;;  %s5101_s6 = inlined_call_operand.vmem [shape: f32[1,128], index: 6, kind: input, shape index: {}]   ;;  %s5102_s7 = inlined_call_operand.vmem [shape: bf16[128,128], index: 7, kind: input, shape index: {}]   ;;  %s5103_s8 = inlined_call_operand.vmem [shape: f32[1,128], index: 8, kind: input, shape index: {}]   ;;  %s5104_s9 = inlined_call_operand.vmem [shape: f32[1,128], index: 9, kind: input, shape index: {}]   ;;  %s5105_s10 = inlined_call_operand.vmem [shape: bf16[2,8,8,128], index: 10, kind: output, shape index: {}]  }
   0x1   :  { %s4132_s15 = smov 0   ;;  %s4134_s16 = smov 0  }
   0x2   :  { %s4136_s17 = smov 0  }
   0x3 LB: > { %s29_s18 = sadd.s32 1, %s4063_s15  ;;  %s32_s19 = sadd.s32 1, %s4067_s16  ;;  %s4071_s17 = sphi %s4136_s17, %s20_s17   ;;  %s4067_s16 = sphi %s4134_s16, %s5129_s16   ;;  %s4063_s15 = sphi %s4132_s15, %s5128_s15   ;;  %s4059_s14 = sphi %s4130_s14, %s5127_s14   ;;  %s4055_s13 = sphi %s4128_s13, %s5126_s13  }
   0x4   : > { %p30_p0 = scmp.ge.s32.totalorder %s29_s18, 2  ;;  %p3079_p1 = scmp.ge.s32.totalorder %s4071_s17, 1 }
   0x5   : > { %p326_p2 = scmp.lt.s32.totalorder %s4071_s17, 5 }
   0x6   : > { %s5131_s18 = smov (%p30_p0, %s29_s18), 0  ;;  %s5133_s19 = smov (!%p30_p0, %s32_s19), %s4067_s16 }
   0x7   : > { %p327_p3 = pnand %p3079_p1, %p326_p2  ;;  %p34_p4 = scmp.ge.s32.totalorder %s5133_s19, 2 }
   0x8   : > { %p368_p5 = scmp.lt.s32.totalorder (!%p327_p3), %s4059_s14, 1  ;;  %s3803_s24 = sshll.u32 (!%p327_p3), %s4055_s13, 5 }
   0x9   : > { %s5135_s19 = smov (%p34_p4, %s5133_s19), 0  ;;  %330 = sbr.rel (%p327_p3) target bundleno = 553 (0x229), region = 60 }
   0xa   : > { %5106 = sst [smem:[#allocation3_spill]] %s5135_s19  ;;  %s4650_s26 = sshll.u32 (!%p327_p3), %s4055_s13, 2 }
   0xb   : > { %s3464_s30 = sadd.s32 (!%p327_p3), 4294967295, %s4650_s26  ;;  %p376_p6 = scmp.lt.s32.totalorder (!%p327_p3), %s4650_s26, 7 }
   0xe   : > { %v3826_v0 = vld [vmem:[%s5096_s1 + $0x38] sm:$0xff]  ;;  %v3825_v4 = vld [vmem:[%s5096_s1 + $0x30] sm:$0xff]  ;;  %s5137_s14 = smov (!%p368_p5, %s4059_s14), 1  ;;  %v3824_v8 = vld [vmem:[%s5096_s1 + $0x28] sm:$0xff]  ;;  %vm1631_vm0 = vcmask 1040384   ;;  %vm1738_vm8 = vcmask 1043456  }
   0xf   : > { %v3834_v1 = vld [vmem:[%s5096_s1 + $0x78] sm:$0xff]  ;;  %1358 = vmatpush.bf16.msra.mxu0 %v3826_v0  ;;  %v3833_v5 = vld [vmem:[%s5096_s1 + $0x70] sm:$0xff]  ;;  %s3986_s23 = smul.u32 384, %s5137_s14  ;;  %v3832_v9 = vld [vmem:[%s5096_s1 + $0x68] sm:$0xff]  ;;  %vm1632_vm1 = vsmask.f32 256 }
  0x10   : > { %v3842_v2 = vld [vmem:[%s5096_s1 + $0xb8] sm:$0xff]  ;;  %1382 = vmatpush.bf16.msra.mxu1 %v3834_v1  ;;  %v3841_v6 = vld [vmem:[%s5096_s1 + $0xb0] sm:$0xff]  ;;  %v3840_v10 = vld [vmem:[%s5096_s1 + $0xa8] sm:$0xff]  ;;  %vm1652_vm2 = vsmask.f32 7938  ;;  %s5139_s26 = smov (!%p376_p6, %s4650_s26), 7 }
  0x11   : > { %v3850_v3 = vld [vmem:[%s5096_s1 + $0xf8] sm:$0xff]  ;;  %1406 = vmatpush.bf16.msra.mxu2 %v3842_v2  ;;  %v3849_v7 = vld [vmem:[%s5096_s1 + $0xf0] sm:$0xff]  ;;  %s372_s11 = scalar_lea.vmem %s5095_s0, %s3986_s23  ;;  %v3848_v11 = vld [vmem:[%s5096_s1 + $0xe8] sm:$0xff] }
  0x12   : > { %1430 = vmatpush.bf16.msra.mxu3 %v3850_v3  ;;  %s4203_s25 = scalar_lea.vmem %s372_s11, %s3803_s24  ;;  %v3823_v12 = vld [vmem:[%s5096_s1 + $0x20] sm:$0xff]  ;;  %v3822_v24 = vld [vmem:[%s5096_s1 + $0x18] sm:$0xff]  ;;  %v3821_v30 = vld [vmem:[%s5096_s1 + $0x10] sm:$0xff]  ;;  %s3082_s24 = sshll.u32 %s5137_s14, 3 }
  0x13   : > { %1359 = vmatpush.bf16.msra.mxu0 %v3825_v4  ;;  %v3831_v13 = vld [vmem:[%s5096_s1 + $0x60] sm:$0xff]  ;;  %v4221_v17 = vld [vmem:[%s4203_s25 + $0x8] sm:$0xf]  ;;  %v404_v19 = vld [vmem:[%s4203_s25 + $0xc] sm:$0x1] }
  0x14   : > { %1383 = vmatpush.bf16.msra.mxu1 %v3833_v5  ;;  %v3839_v14 = vld [vmem:[%s5096_s1 + $0xa0] sm:$0xff]  ;;  %v472_v22 = vunpack.c.l.b16 %v4221_v17  ;;  %v473_v23 = vunpack.c.l.b16 %v404_v19  ;;  %v3830_v25 = vld [vmem:[%s5096_s1 + $0x58] sm:$0xff]  ;;  %v3829_v33 = vld [vmem:[%s5096_s1 + $0x50] sm:$0xff] }
  0x15   : > { %1407 = vmatpush.bf16.msra.mxu2 %v3841_v6  ;;  %v3847_v15 = vld [vmem:[%s5096_s1 + $0xe0] sm:$0xff]  ;;  %v3838_v28 = vld [vmem:[%s5096_s1 + $0x98] sm:$0xff]  ;;  %v3837_v34 = vld [vmem:[%s5096_s1 + $0x90] sm:$0xff] }
  0x16   : > { %1431 = vmatpush.bf16.msra.mxu3 %v3849_v7  ;;  %v4218_v16 = vld [vmem:[%s4203_s25] sm:$0xf]  ;;  %v403_v18 = vld [vmem:[%s4203_s25 + $0x4] sm:$0x1]  ;;  %v483_v27 = vpack.c.b16 %v473_v23, %v472_v22  ;;  %v3846_v29 = vld [vmem:[%s5096_s1 + $0xd8] sm:$0xff] }
  0x17   : > { %1360 = vmatpush.bf16.msra.mxu0 %v3824_v8  ;;  %v470_v20 = vunpack.c.l.b16 %v4218_v16  ;;  %v471_v21 = vunpack.c.l.b16 %v403_v18  ;;  %v4253_v35 = vld [vmem:[%s4203_s25 + $0x10] sm:$0xf]  ;;  %v405_v40 = vld [vmem:[%s4203_s25 + $0x14] sm:$0x1]  ;;  %v4260_v42 = vld [vmem:[%s4203_s25 + $0x18] sm:$0xf] }
  0x18   : > { %1384 = vmatpush.bf16.msra.mxu1 %v3832_v9  ;;  %v498_v32 = vshll.u32 %v483_v27, 16  ;;  %v496_v38 = vshrl.u32 %v483_v27, 16  ;;  %v3845_v41 = vld [vmem:[%s5096_s1 + $0xd0] sm:$0xff]  ;;  %v406_v43 = vld [vmem:[%s4203_s25 + $0x1c] sm:$0x1]  ;;  %v3820_v44 = vld [vmem:[%s5096_s1 + $0x8] sm:$0xff]  ;;  %v474_v45 = vunpack.c.l.b16 %v4253_v35  ;;  %v475_v46 = vunpack.c.l.b16 %v405_v40 }
  0x19   : > { %1408 = vmatpush.bf16.msra.mxu2 %v3840_v10  ;;  %v482_v26 = vpack.c.b16 %v471_v21, %v470_v20  ;;  %v3828_v47 = vld [vmem:[%s5096_s1 + $0x48] sm:$0xff]  ;;  %v4271_v50 = vld [vmem:[%s4203_s25 + $0xc0] sm:$0xf]  ;;  %v476_v52 = vunpack.c.l.b16 %v4260_v42  ;;  %v477_v53 = vunpack.c.l.b16 %v406_v43  ;;  %v3858_v2 = vld [vmem:[%s5096_s1 + $0x138] sm:$0xff]  ;;  %v872_v6 = vpack.c.b16 %v472_v22, %v470_v20 }
  0x1a   : > { %1432 = vmatpush.bf16.msra.mxu3 %v3848_v11  ;;  %v500_v39 = vrot.slane %v498_v32, 1  ;;  %v4274_v51 = vld [vmem:[%s4203_s25 + $0xc8] sm:$0xf]  ;;  %v3819_v56 = vld [vmem:[%s5096_s1] sm:$0xff]  ;;  %v542_v61 = vunpack.c.l.b16 %v4271_v50  ;;  %v484_v3 = vpack.c.b16 %v475_v46, %v474_v45  ;;  %v3874_v5 = vld [vmem:[%s5096_s1 + $0x1b8] sm:$0xff] }
  0x1b   : > { %1361 = vmatpush.bf16.msra.mxu0 %v3823_v12  ;;  %v491_v31 = vshll.u32 %v482_v26, 16  ;;  %v489_v36 = vshrl.u32 %v482_v26, 16  ;;  %v3836_v54 = vld [vmem:[%s5096_s1 + $0x88] sm:$0xff]  ;;  %v3827_v57 = vld [vmem:[%s5096_s1 + $0x40] sm:$0xff]  ;;  %v544_v62 = vunpack.c.l.b16 %v4274_v51  ;;  %v485_v4 = vpack.c.b16 %v477_v53, %v476_v52  ;;  %v3866_v12 = vld [vmem:[%s5096_s1 + $0x178] sm:$0xff] }
  0x1c   : > { %1385 = vmatpush.bf16.msra.mxu1 %v3831_v13  ;;  %v501_v49 = vor.u32 %v500_v39, %v496_v38  ;;  %v3844_v55 = vld [vmem:[%s5096_s1 + $0xc8] sm:$0xff]  ;;  %v3835_v58 = vld [vmem:[%s5096_s1 + $0x80] sm:$0xff]  ;;  %v505_v10 = vshll.u32 %v484_v3, 16  ;;  %v3882_v13 = vld [vmem:[%s5096_s1 + $0x1f8] sm:$0xff]  ;;  %v503_v16 = vshrl.u32 %v484_v3, 16 }
  0x1d   : > { %1409 = vmatpush.bf16.msra.mxu2 %v3839_v14  ;;  %v493_v37 = vrot.slane %v491_v31, 1  ;;  %v3843_v59 = vld [vmem:[%s5096_s1 + $0xc0] sm:$0xff]  ;;  %v3805_v63 = vld [vmem:[%s4203_s25 + $0x64] sm:$0xf0]  ;;  %v875_v9 = vpack.c.b16 %v544_v62, %v542_v61  ;;  %v512_v11 = vshll.u32 %v485_v4, 16  ;;  %v3857_v14 = vld [vmem:[%s5096_s1 + $0x130] sm:$0xff] }
  0x1e   : > { %1433 = vmatpush.bf16.msra.mxu3 %v3847_v15  ;;  %v3142_v60 = vld [vmem:[%s4203_s25 + $0x60] sm:$0xf]  ;;  %v699_v1 = vunpack.c.l.b16 %v501_v49  ;;  %v3873_v15 = vld [vmem:[%s5096_s1 + $0x1b0] sm:$0xff]  ;;  %v510_v17 = vshrl.u32 %v485_v4, 16  ;;  %v507_v19 = vrot.slane %v505_v10, 1  ;;  %v3856_v26 = vld [vmem:[%s5096_s1 + $0x128] sm:$0xff] }
  0x1f   : > { %1362 = vmatpush.bf16.msra.mxu0 %v3822_v24  ;;  %v494_v48 = vor.u32 %v493_v37, %v489_v36  ;;  %v3143_v7 = vor.u32 %v3805_v63, %v3142_v60  ;;  %v3865_v18 = vld [vmem:[%s5096_s1 + $0x170] sm:$0xff]  ;;  %v514_v20 = vrot.slane %v512_v11, 1  ;;  %v4333_v21 = vld [vmem:[%s4203_s25 + $0x20] sm:$0xf]  ;;  %v4336_v22 = vld [vmem:[%s4203_s25 + $0x28] sm:$0xf] }
  0x20   : > { %1386 = vmatpush.bf16.msra.mxu1 %v3830_v25  ;;  %v3881_v23 = vld [vmem:[%s5096_s1 + $0x1f0] sm:$0xff]  ;;  %v407_v24 = vld [vmem:[%s4203_s25 + $0x24] sm:$0x1]  ;;  %v408_v25 = vld [vmem:[%s4203_s25 + $0x2c] sm:$0x1] }
  0x21   : > { %1410 = vmatpush.bf16.msra.mxu2 %v3838_v28  ;;  %v693_v0 = vunpack.c.l.b16 %v494_v48  ;;  %v3872_v27 = vld [vmem:[%s5096_s1 + $0x1a8] sm:$0xff]  ;;  %v478_v28 = vunpack.c.l.b16 %v4333_v21  ;;  %v515_v31 = vor.u32 %v514_v20, %v510_v17  ;;  %v4352_v32 = vld [vmem:[%s4203_s25 + $0xd0] sm:$0xf]  ;;  %v481_v36 = vunpack.c.l.b16 %v408_v25  ;;  %v3855_v39 = vld [vmem:[%s5096_s1 + $0x120] sm:$0xff] }
  0x22   : > { %1434 = vmatpush.bf16.msra.mxu3 %v3846_v29  ;;  %v480_v29 = vunpack.c.l.b16 %v4336_v22  ;;  %v3864_v37 = vld [vmem:[%s5096_s1 + $0x168] sm:$0xff]  ;;  %v3871_v40 = vld [vmem:[%s5096_s1 + $0x1a0] sm:$0xff]  ;;  %v3806_v46 = vld [vmem:[%s4203_s25 + $0x74] sm:$0xf0] }
  0x23   : > { %1363 = vmatpush.bf16.msra.mxu0 %v3821_v30  ;;  %v874_v8 = vpack.c.b16 %v699_v1, %v693_v0  ;;  %v508_v30 = vor.u32 %v507_v19, %v503_v16  ;;  %v3880_v38 = vld [vmem:[%s5096_s1 + $0x1e8] sm:$0xff]  ;;  %v711_v48 = vunpack.c.l.b16 %v515_v31  ;;  %v3878_v35 = vld [vmem:[%s5096_s1 + $0x1d8] sm:$0xff]  ;;  %v3853_v42 = vld [vmem:[%s5096_s1 + $0x110] sm:$0xff] }
  0x24   : > { %1387 = vmatpush.bf16.msra.mxu1 %v3829_v33  ;;  %v4355_v33 = vld [vmem:[%s4203_s25 + $0xd8] sm:$0xf]  ;;  %v487_v53 = vpack.c.b16 %v481_v36, %v480_v29  ;;  %v3112_v3 = vld [vmem:[%s4203_s25 + $0xcc] sm:$0x1]  ;;  %v4424_v16 = vld [vmem:[%s4203_s25 + $0xe0] sm:$0xf] }
  0x25   : > { %1411 = vmatpush.bf16.msra.mxu2 %v3837_v34  ;;  %v479_v34 = vunpack.c.l.b16 %v407_v24  ;;  %v548_v43 = vunpack.c.l.b16 %v4355_v33  ;;  %v3852_v10 = vld [vmem:[%s5096_s1 + $0x108] sm:$0xff]  ;;  %v3851_v20 = vld [vmem:[%s5096_s1 + $0x100] sm:$0xff]  ;;  %v550_v36 = vunpack.c.l.b16 %v4424_v16  ;;  %vm4590_vm3 = vmand %vm1631_vm0, %vm1632_vm1 }
  0x26   : > { %1435 = vmatpush.bf16.msra.mxu3 %v3845_v41  ;;  %v546_v41 = vunpack.c.l.b16 %v4352_v32  ;;  %v526_v1 = vshll.u32 %v487_v53, 16  ;;  %v3868_v11 = vld [vmem:[%s5096_s1 + $0x188] sm:$0xff]  ;;  %v3859_v50 = vld [vmem:[%s5096_s1 + $0x140] sm:$0xff]  ;;  %v3886_v32 = vld [vmem:[%s5096_s1 + $0x218] sm:$0xff] }
  0x27   : > { %1364 = vmatpush.bf16.msra.mxu0 %v3820_v44  ;;  %v3154_v44 = vld [vmem:[%s4203_s25 + $0x70] sm:$0xf]  ;;  %v486_v49 = vpack.c.b16 %v479_v34, %v478_v28  ;;  %v4427_v17 = vld [vmem:[%s4203_s25 + $0xe8] sm:$0xf]  ;;  %v3875_v51 = vld [vmem:[%s5096_s1 + $0x1c0] sm:$0xff] }
  0x28   : > { %1388 = vmatpush.bf16.msra.mxu1 %v3828_v47  ;;  %v705_v47 = vunpack.c.l.b16 %v508_v30  ;;  %v884_v63 = vpack.c.b16 %v548_v43, %v546_v41  ;;  %v3876_v19 = vld [vmem:[%s5096_s1 + $0x1c8] sm:$0xff]  ;;  %vm4597_vm4 = vmand %vm1631_vm0, %vm1652_vm2 }
  0x29   : > { %1412 = vmatpush.bf16.msra.mxu2 %v3836_v54  ;;  %v3863_v54 = vld [vmem:[%s5096_s1 + $0x160] sm:$0xff]  ;;  %v519_v0 = vshll.u32 %v486_v49, 16  ;;  %v517_v4 = vshrl.u32 %v486_v49, 16  ;;  %v3807_v30 = vld [vmem:[%s4203_s25 + $0x84] sm:$0xf0]  ;;  %vm4763_vm11 = vmand %vm1738_vm8, %vm1652_vm2 }
  0x2a   : > { %1436 = vmatpush.bf16.msra.mxu3 %v3844_v55  ;;  %v3879_v55 = vld [vmem:[%s5096_s1 + $0x1e0] sm:$0xff]  ;;  %v883_v60 = vpack.c.b16 %v711_v48, %v705_v47  ;;  %v3114_v48 = vld [vmem:[%s4203_s25 + $0xdc] sm:$0x1]  ;;  %v3888_v49 = vld [vmem:[%s5096_s1 + $0x228] sm:$0xff] }
  0x2b   : > { %1365 = vmatpush.bf16.msra.mxu0 %v3819_v56  ;;  %v3854_v56 = vld [vmem:[%s5096_s1 + $0x118] sm:$0xff] }
  0x2c   : > { %1389 = vmatpush.bf16.msra.mxu1 %v3827_v57  ;;  %v3870_v57 = vld [vmem:[%s5096_s1 + $0x198] sm:$0xff] }
  0x2d   : > { %1413 = vmatpush.bf16.msra.mxu2 %v3835_v58  ;;  %v881_v58 = vpack.c.b16 %v476_v52, %v474_v45  ;;  %v3869_v45 = vld [vmem:[%s5096_s1 + $0x190] sm:$0xff]  ;;  %v3111_v52 = vld [vmem:[%s4203_s25 + $0xc4] sm:$0x1] }
  0x2e   : > { %1437 = vmatpush.bf16.msra.mxu3 %v3843_v59  ;;  %1366 = vmatmul.bf16.vlgmr.msra.gmra.mxu0 %v872_v6  ;;  %v3155_v59 = vor.u32 %v3806_v46, %v3154_v44  ;;  %v524_v6 = vshrl.u32 %v487_v53, 16  ;;  %v3889_v46 = vld [vmem:[%s5096_s1 + $0x230] sm:$0xff] }
  0x2f   : > { %1454 = vmatpush.bf16.msrb.mxu0 %v3858_v2  ;;  %1390 = vmatmul.bf16.vlgmr.msra.gmra.mxu1 %v3143_v7  ;;  %v3862_v2 = vld [vmem:[%s5096_s1 + $0x158] sm:$0xff]  ;;  %v528_v7 = vrot.slane %v526_v1, 1 }
  0x30   : > { %1414 = vmatmul.bf16.vlgmr.msra.gmra.mxu2 %v874_v8  ;;  %1478 = vmatpush.bf16.msrb.mxu1 %v3866_v12  ;;  %v3861_v8 = vld [vmem:[%s5096_s1 + $0x150] sm:$0xff]  ;;  %v543_v12 = vunpack.c.l.b16 %v3111_v52  ;;  %v3150_v52 = vld [vmem:[%s4203_s25 + $0x68] sm:$0xf] }
  0x31   : > { %1502 = vmatpush.bf16.msrb.mxu2 %v3874_v5  ;;  %1438 = vmatmul.bf16.vlgmr.msra.gmra.mxu3 %v875_v9  ;;  %v521_v5 = vrot.slane %v519_v0, 1  ;;  %v3877_v9 = vld [vmem:[%s5096_s1 + $0x1d0] sm:$0xff] }
  0x32   : > { %1526 = vmatpush.bf16.msrb.mxu3 %v3882_v13  ;;  %v545_v13 = vunpack.c.l.b16 %v3112_v3  ;;  %v554_v24 = vpack.c.b16 %v543_v12, %v542_v61  ;;  %v3816_v3 = vld [vmem:[%s4203_s25 + $0x6c] sm:$0xf0]  ;;  %v3115_v12 = vld [vmem:[%s4203_s25 + $0xe4] sm:$0x1] }
  0x33   : > { %1455 = vmatpush.bf16.msrb.mxu0 %v3857_v14  ;;  %v522_v14 = vor.u32 %v521_v5, %v517_v4 }
  0x34   : > { %1479 = vmatpush.bf16.msrb.mxu1 %v3865_v18  ;;  %v3860_v18 = vld [vmem:[%s5096_s1 + $0x148] sm:$0xff]  ;;  %v555_v25 = vpack.c.b16 %v545_v13, %v544_v62  ;;  %v563_v61 = vshll.u32 %v554_v24, 16  ;;  %v561_v47 = vshrl.u32 %v554_v24, 16  ;;  %v4512_v24 = vld [vmem:[%s4203_s25 + $0x20] sm:$0xf] }
  0x35   : > { %1503 = vmatpush.bf16.msrb.mxu2 %v3873_v15  ;;  %v529_v15 = vor.u32 %v528_v7, %v524_v6  ;;  %v717_v31 = vunpack.c.l.b16 %v522_v14  ;;  %v3151_v6 = vor.u32 %v3816_v3, %v3150_v52  ;;  %v3885_v7 = vld [vmem:[%s5096_s1 + $0x210] sm:$0xff]  ;;  %v3116_v13 = vld [vmem:[%s4203_s25 + $0xec] sm:$0x1]  ;;  %v3174_v52 = vld [vmem:[%s4203_s25 + $0x88] sm:$0xf] }
  0x36   : > { %1527 = vmatpush.bf16.msrb.mxu3 %v3881_v23  ;;  %v3867_v23 = vld [vmem:[%s5096_s1 + $0x180] sm:$0xff]  ;;  %v570_v62 = vshll.u32 %v555_v25, 16  ;;  %v565_v21 = vrot.slane %v563_v61, 1  ;;  %v568_v22 = vshrl.u32 %v555_v25, 16  ;;  %v3884_v14 = vld [vmem:[%s5096_s1 + $0x208] sm:$0xff]  ;;  %v620_v61 = vunpack.c.l.b16 %v4512_v24 }
  0x37   : > { %1456 = vmatpush.bf16.msrb.mxu0 %v3856_v26  ;;  %v3890_v26 = vld [vmem:[%s5096_s1 + $0x238] sm:$0xff]  ;;  %v723_v34 = vunpack.c.l.b16 %v529_v15  ;;  %v551_v15 = vunpack.c.l.b16 %v3115_v12  ;;  %v3883_v25 = vld [vmem:[%s5096_s1 + $0x200] sm:$0xff]  ;;  %v3818_v3 = vld [vmem:[%s4203_s25 + $0x8c] sm:$0xf0] }
  0x38   : > { %1480 = vmatpush.bf16.msrb.mxu1 %v3864_v37  ;;  %v552_v37 = vunpack.c.l.b16 %v4427_v17 }
  0x39   : > { %1504 = vmatpush.bf16.msrb.mxu2 %v3872_v27  ;;  %v3166_v27 = vld [vmem:[%s4203_s25 + $0x80] sm:$0xf] }
  0x3a   : > { %1528 = vmatpush.bf16.msrb.mxu3 %v3880_v38  ;;  %v890_v38 = vpack.c.b16 %v480_v29, %v478_v28  ;;  %v893_v44 = vpack.c.b16 %v552_v37, %v550_v36  ;;  %v572_v28 = vrot.slane %v570_v62, 1  ;;  %v3113_v29 = vld [vmem:[%s4203_s25 + $0xd4] sm:$0x1]  ;;  %v3162_v62 = vld [vmem:[%s4203_s25 + $0x78] sm:$0xf] }
  0x3b   : > { %1457 = vmatpush.bf16.msrb.mxu0 %v3855_v39  ;;  %v3167_v39 = vor.u32 %v3807_v30, %v3166_v27  ;;  %v547_v53 = vunpack.c.l.b16 %v3113_v29 }
  0x3c   : > { %1481 = vmatpush.bf16.msrb.mxu1 %v3863_v54  ;;  %v549_v54 = vunpack.c.l.b16 %v3114_v48 }
  0x3d   : > { %1505 = vmatpush.bf16.msrb.mxu2 %v3871_v40  ;;  %v892_v40 = vpack.c.b16 %v723_v34, %v717_v31  ;;  %v3158_v34 = vld [vmem:[%s4203_s25 + $0x130] sm:$0xf] }
  0x3e   : > { %1529 = vmatpush.bf16.msrb.mxu3 %v3879_v55  ;;  %1371 = vmatmul.bf16.gmra.mxu0 %v881_v58  ;;  %v566_v55 = vor.u32 %v565_v21, %v561_v47  ;;  %v4478_v58 = vld [vmem:[%s4203_s25 + $0x10] sm:$0xf] }
  0x3f   : > { %1458 = vmatpush.bf16.msrb.mxu0 %v3854_v56  ;;  %1395 = vmatmul.bf16.gmra.mxu1 %v3155_v59  ;;  %v573_v56 = vor.u32 %v572_v28, %v568_v22  ;;  %v3887_v59 = vld [vmem:[%s5096_s1 + $0x220] sm:$0xff]  ;;  %v3134_v22 = vld [vmem:[%s4203_s25 + $0xc] sm:$0x1]  ;;  %v3135_v28 = vld [vmem:[%s4203_s25 + $0x14] sm:$0x1] }
  0x40   : > { %1419 = vmatmul.bf16.gmra.mxu2 %v883_v60  ;;  %1482 = vmatpush.bf16.msrb.mxu1 %v3862_v2  ;;  %v556_v60 = vpack.c.b16 %v547_v53, %v546_v41  ;;  %v695_v0 = vunpack.c.l.b16 %v566_v55  ;;  %v3146_v2 = vld [vmem:[%s4203_s25 + $0x120] sm:$0xf]  ;;  %v615_v29 = vunpack.c.l.b16 %v3134_v22  ;;  %v617_v48 = vunpack.c.l.b16 %v3135_v28  ;;  %v3124_v55 = vld [vmem:[%s4203_s25 + $0x30] sm:$0xf] }
  0x41   : > { %1506 = vmatpush.bf16.msrb.mxu2 %v3870_v57  ;;  %1443 = vmatmul.bf16.gmra.mxu3 %v884_v63  ;;  %v4475_v57 = vld [vmem:[%s4203_s25 + $0x8] sm:$0xf]  ;;  %v557_v63 = vpack.c.b16 %v549_v54, %v548_v43  ;;  %v701_v1 = vunpack.c.l.b16 %v573_v56 }
  0x42   : > { %1530 = vmatpush.bf16.msrb.mxu3 %v3878_v35  ;;  %v3810_v35 = vld [vmem:[%s4203_s25 + $0x124] sm:$0xf0]  ;;  %v577_v43 = vshll.u32 %v556_v60, 16 }
  0x43   : > { %1459 = vmatpush.bf16.msrb.mxu0 %v3853_v42  ;;  %v614_v42 = vunpack.c.l.b16 %v4475_v57  ;;  %v3147_v41 = vor.u32 %v3810_v35, %v3146_v2  ;;  %v877_v33 = vpack.c.b16 %v701_v1, %v695_v0  ;;  %v584_v4 = vshll.u32 %v557_v63, 16  ;;  %v3123_v54 = vld [vmem:[%s4203_s25 + $0x28] sm:$0xf]  ;;  %v3170_v0 = vld [vmem:[%s4203_s25 + $0x140] sm:$0xf] }
  0x44   : > { %1483 = vmatpush.bf16.msrb.mxu1 %v3861_v8  ;;  %v575_v8 = vshrl.u32 %v556_v60, 16  ;;  %v3812_v1 = vld [vmem:[%s4203_s25 + $0x144] sm:$0xf0]  ;;  %v622_v2 = vunpack.c.l.b16 %v3123_v54  ;;  %v624_v35 = vunpack.c.l.b16 %v3124_v55  ;;  %v3175_v57 = vor.u32 %v3818_v3, %v3174_v52 }
  0x45   : > { %1507 = vmatpush.bf16.msrb.mxu2 %v3869_v45  ;;  %v616_v45 = vunpack.c.l.b16 %v4478_v58  ;;  %v626_v56 = vpack.c.b16 %v615_v29, %v614_v42 }
  0x46   : > { %1531 = vmatpush.bf16.msrb.mxu3 %v3877_v9  ;;  %v579_v9 = vrot.slane %v577_v43, 1 }
  0x47   : > { %1460 = vmatpush.bf16.msrb.mxu0 %v3852_v10  ;;  %v878_v5 = vpack.c.b16 %v616_v45, %v614_v42  ;;  %v582_v10 = vshrl.u32 %v557_v63, 16  ;;  %v633_v42 = vshrl.u32 %v626_v56, 16 }
  0x48   : > { %1484 = vmatpush.bf16.msrb.mxu1 %v3860_v18  ;;  %v553_v18 = vunpack.c.l.b16 %v3116_v13 }
  0x49   : > { %1508 = vmatpush.bf16.msrb.mxu2 %v3868_v11  ;;  %v586_v11 = vrot.slane %v584_v4, 1  ;;  %v896_v4 = vpack.c.b16 %v624_v35, %v622_v2 }
  0x4a   : > { %1532 = vmatpush.bf16.msrb.mxu3 %v3876_v19  ;;  %v580_v19 = vor.u32 %v579_v9, %v575_v8  ;;  %v559_v27 = vpack.c.b16 %v553_v18, %v552_v37 }
  0x4b   : > { %1461 = vmatpush.bf16.msrb.mxu0 %v3851_v20  ;;  %v587_v20 = vor.u32 %v586_v11, %v582_v10 }
  0x4c   : > { %1485 = vmatpush.bf16.msrb.mxu1 %v3859_v50  ;;  %v707_v30 = vunpack.c.l.b16 %v580_v19  ;;  %v3811_v50 = vld [vmem:[%s4203_s25 + $0x134] sm:$0xf0]  ;;  %v596_v47 = vshrl.u32 %v559_v27, 16 }
  0x4d   : > { %1509 = vmatpush.bf16.msrb.mxu2 %v3867_v23  ;;  %v4509_v23 = vld [vmem:[%s4203_s25 + $0x18] sm:$0xf]  ;;  %v713_v31 = vunpack.c.l.b16 %v587_v20 }
  0x4e   : > { %1533 = vmatpush.bf16.msrb.mxu3 %v3875_v51  ;;  %1376 = vmatmul.bf16.gmra.mxu0 %v890_v38  ;;  %v618_v51 = vunpack.c.l.b16 %v4509_v23  ;;  %v3817_v38 = vld [vmem:[%s4203_s25 + $0x7c] sm:$0xf0] }
  0x4f   : > { %1550 = vmatpush.bf16.msra.mxu0 %v3890_v26  ;;  %1400 = vmatmul.bf16.gmra.mxu1 %v3167_v39  ;;  %v558_v26 = vpack.c.b16 %v551_v15, %v550_v36  ;;  %v3159_v39 = vor.u32 %v3811_v50, %v3158_v34  ;;  %v598_v36 = vshll.u32 %v559_v27, 16  ;;  %v3163_v17 = vor.u32 %v3817_v38, %v3162_v62  ;;  %v3138_v27 = vld [vmem:[%s4203_s25 + $0x2c] sm:$0x1] }
  0x50   : > { %1424 = vmatmul.bf16.gmra.mxu2 %v892_v40  ;;  %v886_v40 = vpack.c.b16 %v713_v31, %v707_v30  ;;  %v3139_v30 = vld [vmem:[%s4203_s25 + $0x34] sm:$0x1]  ;;  %v623_v31 = vunpack.c.l.b16 %v3138_v27 }
  0x51   : > { %1448 = vmatmul.bf16.gmra.mxu3 %v893_v44  ;;  %v591_v16 = vshll.u32 %v558_v26, 16  ;;  %v887_v44 = vpack.c.b16 %v620_v61, %v618_v51  ;;  %v589_v37 = vshrl.u32 %v558_v26, 16  ;;  %v600_v21 = vrot.slane %v598_v36, 1 }
  0x52   : > { %v625_v34 = vunpack.c.l.b16 %v3139_v30  ;;  %v630_v38 = vpack.c.b16 %v623_v31, %v622_v2  ;;  %v3906_v31 = vld [vmem:[%s5099_s4 + $0x78] sm:$0xff] }
  0x53   : > { %1551 = vmatpush.bf16.msra.mxu0 %v3889_v46  ;;  %v593_v46 = vrot.slane %v591_v16, 1  ;;  %v601_v53 = vor.u32 %v600_v21, %v596_v47  ;;  %2661 = vmatpush.bf16.msra.mxu2 %v3906_v31  ;;  %v4693_v31 = vld [vmem:[%s5098_s3] ss:$0 sm:$0xff] }
  0x54   : > { %v663_v16 = vshll.u32 %v630_v38, 16 }
  0x55   : > { %v725_v63 = vunpack.c.l.b16 %v601_v53 }
  0x57   : > { %1552 = vmatpush.bf16.msra.mxu0 %v3888_v49  ;;  %v594_v49 = vor.u32 %v593_v46, %v589_v37 }
  0x59   : > { %v719_v60 = vunpack.c.l.b16 %v594_v49 }
  0x5b   : > { %1553 = vmatpush.bf16.msra.mxu0 %v3887_v59  ;;  %v627_v59 = vpack.c.b16 %v617_v48, %v616_v45  ;;  %v895_v43 = vpack.c.b16 %v725_v63, %v719_v60 }
  0x5d   : > { %v640_v58 = vshrl.u32 %v627_v59, 16 }
  0x5e   : > { %1462 = vmatmul.bf16.vlgmr.msrb.gmra.mxu0 %v3147_v41  ;;  %v642_v41 = vshll.u32 %v627_v59, 16 }
  0x5f   : > { %1554 = vmatpush.bf16.msra.mxu0 %v3886_v32  ;;  %1486 = vmatmul.bf16.vlgmr.msrb.gmra.mxu1 %v877_v33  ;;  %v635_v32 = vshll.u32 %v626_v56, 16  ;;  %v3171_v33 = vor.u32 %v3812_v1, %v3170_v0 }
  0x60   : > { %1510 = vmatmul.bf16.vlgmr.msrb.gmra.mxu2 %v878_v5  ;;  %v644_v45 = vrot.slane %v642_v41, 1 }
  0x61   : > { %1534 = vmatmul.bf16.vlgmr.msrb.gmra.mxu3 %v3151_v6  ;;  %v637_v5 = vrot.slane %v635_v32, 1  ;;  %v3136_v6 = vld [vmem:[%s4203_s25 + $0x1c] sm:$0x1] }
  0x62   : > { %v619_v8 = vunpack.c.l.b16 %v3136_v6  ;;  %v645_v11 = vor.u32 %v644_v45, %v640_v58 }
  0x63   : > { %1555 = vmatpush.bf16.msra.mxu0 %v3885_v7  ;;  %v3137_v7 = vld [vmem:[%s4203_s25 + $0x24] sm:$0x1]  ;;  %v638_v10 = vor.u32 %v637_v5, %v633_v42 }
  0x64   : > { %v621_v9 = vunpack.c.l.b16 %v3137_v7  ;;  %v628_v12 = vpack.c.b16 %v619_v8, %v618_v51  ;;  %v703_v15 = vunpack.c.l.b16 %v645_v11  ;;  %v3898_v8 = vld [vmem:[%s5099_s4 + $0x38] sm:$0xff]  ;;  %v1634_v11 = vld [vmem:[#allocation2] sm:$0x1] }
  0x65   : > { %2642 = vmatpush.bf16.msra.mxu1 %v3898_v8  ;;  %v3893_v8 = vld [vmem:[%s5099_s4 + $0x10] sm:$0xff] }
  0x66   : > { %v629_v13 = vpack.c.b16 %v621_v9, %v620_v61  ;;  %v649_v19 = vshll.u32 %v628_v12, 16  ;;  %v647_v23 = vshrl.u32 %v628_v12, 16 }
  0x67   : > { %1556 = vmatpush.bf16.msra.mxu0 %v3884_v14  ;;  %v697_v14 = vunpack.c.l.b16 %v638_v10 }
  0x68   : > { %v656_v20 = vshll.u32 %v629_v13, 16  ;;  %v651_v24 = vrot.slane %v649_v19, 1  ;;  %v3897_v19 = vld [vmem:[%s5099_s4 + $0x30] sm:$0xff] }
  0x69   : > { %v880_v18 = vpack.c.b16 %v703_v15, %v697_v14  ;;  %v1635_v15 = vsel %vm4590_vm3, 0, %v1634_v11  ;;  %2643 = vmatpush.bf16.msra.mxu1 %v3897_v19  ;;  %v3945_v11 = vld [vmem:[%s5099_s4 + $0x1b0] sm:$0xff]  ;;  %v4679_v19 = vld [vmem:[%s5097_s2] ss:$0 sm:$0xff] }
  0x6a   : > { %v658_v26 = vrot.slane %v656_v20, 1  ;;  %v652_v50 = vor.u32 %v651_v24, %v647_v23  ;;  %1636 = vst [vmem:[#allocation2] sm:$0x1] %v1635_v15  ;;  %v3914_v24 = vld [vmem:[%s5099_s4 + $0xb8] sm:$0xff] }
  0x6b   : > { %1557 = vmatpush.bf16.msra.mxu0 %v3883_v25  ;;  %v654_v25 = vshrl.u32 %v629_v13, 16  ;;  %v1654_v13 = vld [vmem:[#allocation2 + $0x4] sm:$0x1]  ;;  %2680 = vmatpush.bf16.msra.mxu3 %v3914_v24 }
  0x6c   : > { %v709_v51 = vunpack.c.l.b16 %v652_v50  ;;  %v1655_v20 = vsel %vm4597_vm4, 0, %v1654_v13  ;;  %v3903_v13 = vld [vmem:[%s5099_s4 + $0x60] sm:$0xff] }
  0x6d   : > { %v659_v62 = vor.u32 %v658_v26, %v654_v25  ;;  %1656 = vst [vmem:[#allocation2 + $0x4] sm:$0x1] %v1655_v20  ;;  %v3896_v26 = vld [vmem:[%s5099_s4 + $0x28] sm:$0xff] }
  0x6e   : > { %1467 = vmatmul.bf16.gmra.mxu0 %v3159_v39  ;;  %v631_v39 = vpack.c.b16 %v625_v34, %v624_v35  ;;  %v1637_v34 = vld [vmem:[#allocation2 + $0x8] sm:$0x1]  ;;  %2644 = vmatpush.bf16.msra.mxu1 %v3896_v26 }
  0x6f   : > { %1491 = vmatmul.bf16.gmra.mxu1 %v886_v40  ;;  %v715_v61 = vunpack.c.l.b16 %v659_v62  ;;  %v1638_v50 = vsel %vm4590_vm3, 0, %v1637_v34  ;;  %v1657_v62 = vld [vmem:[#allocation2 + $0xc] sm:$0x1]  ;;  %v1643_v34 = vld [vmem:[#allocation2 + $0x18] sm:$0x1] }
  0x70   : > { %1515 = vmatmul.bf16.gmra.mxu2 %v887_v44  ;;  %v670_v36 = vshll.u32 %v631_v39, 16  ;;  %v661_v44 = vshrl.u32 %v630_v38, 16  ;;  %v668_v37 = vshrl.u32 %v631_v39, 16  ;;  %v3913_v38 = vld [vmem:[%s5099_s4 + $0xb0] sm:$0xff]  ;;  %1639 = vst [vmem:[#allocation2 + $0x8] sm:$0x1] %v1638_v50 }
  0x71   : > { %1539 = vmatmul.bf16.gmra.mxu3 %v3163_v17  ;;  %v889_v40 = vpack.c.b16 %v715_v61, %v709_v51  ;;  %v665_v17 = vrot.slane %v663_v16, 1  ;;  %v1658_v61 = vsel %vm4597_vm4, 0, %v1657_v62  ;;  %v3944_v20 = vld [vmem:[%s5099_s4 + $0x1a8] sm:$0xff]  ;;  %v1663_v50 = vld [vmem:[#allocation2 + $0x1c] sm:$0x1] }
  0x72   : > { %v672_v46 = vrot.slane %v670_v36, 1  ;;  %v3905_v36 = vld [vmem:[%s5099_s4 + $0x70] sm:$0xff]  ;;  %1659 = vst [vmem:[#allocation2 + $0xc] sm:$0x1] %v1658_v61  ;;  %2681 = vmatpush.bf16.msra.mxu3 %v3913_v38 }
  0x73   : > { %v666_v47 = vor.u32 %v665_v17, %v661_v44  ;;  %2662 = vmatpush.bf16.msra.mxu2 %v3905_v36  ;;  %v3909_v61 = vld [vmem:[%s5099_s4 + $0x90] sm:$0xff] }
  0x74   : > { %v673_v21 = vor.u32 %v672_v46, %v668_v37  ;;  %v3912_v37 = vld [vmem:[%s5099_s4 + $0xa8] sm:$0xff] }
  0x75   : > { %v721_v22 = vunpack.c.l.b16 %v666_v47  ;;  %v3894_v47 = vld [vmem:[%s5099_s4 + $0x18] sm:$0xff] }
  0x76   : > { %v727_v28 = vunpack.c.l.b16 %v673_v21  ;;  %v3946_v21 = vld [vmem:[%s5099_s4 + $0x1b8] sm:$0xff]  ;;  %2682 = vmatpush.bf16.msra.mxu3 %v3912_v37  ;;  %v3908_v37 = vld [vmem:[%s5099_s4 + $0x88] sm:$0xff] }
  0x77   : > { %2756 = vmatpush.bf16.msrb.mxu0 %v3946_v21 }
  0x78   : > { %v898_v29 = vpack.c.b16 %v727_v28, %v721_v22 }
  0x7b   : > { %2757 = vmatpush.bf16.msrb.mxu0 %v3945_v11 }
  0x7e   : > { %1472 = vmatmul.bf16.gmra.mxu0 %v3171_v33 }
  0x7f   : > { %1496 = vmatmul.bf16.gmra.mxu1 %v895_v43  ;;  %2758 = vmatpush.bf16.msrb.mxu0 %v3944_v20 }
  0x80   : > { %1520 = vmatmul.bf16.gmra.mxu2 %v896_v4 }
  0x81   : > { %1544 = vmatmul.bf16.gmra.mxu3 %v3175_v57 }
  0x8e   : > { %1558 = vmatmul.bf16.vlgmr.msra.gmra.mxu0 %v880_v18 }
  0x9e   : > { %1563 = vmatmul.bf16.gmra.mxu0 %v889_v40  ;;  %v3895_v40 = vld [vmem:[%s5099_s4 + $0x20] sm:$0xff] }
  0x9f   : > { %2645 = vmatpush.bf16.msra.mxu1 %v3895_v40 }
  0xa3   : > { %2646 = vmatpush.bf16.msra.mxu1 %v3894_v47 }
  0xa7   : > { %2647 = vmatpush.bf16.msra.mxu1 %v3893_v8  ;;  %v1646_v8 = vld [vmem:[#allocation2 + $0x20] sm:$0x1] }
  0xab   : > { %v1367_v48 = vpop.f32.mrf.mxu0 }
  0xac   : > { %v1391_v53 = vpop.f32.mrf.mxu1 }
  0xad   : > { %v1392_v23 = vadd.f32 %v1391_v53, %v1367_v48  ;;  %v1640_v48 = vld [vmem:[#allocation2 + $0x10] sm:$0x1] }
  0xae   : > { %1568 = vmatmul.bf16.gmra.mxu0 %v898_v29  ;;  %v3904_v29 = vld [vmem:[%s5099_s4 + $0x68] sm:$0xff] }
  0xaf   : > { %2663 = vmatpush.bf16.msra.mxu2 %v3904_v29 }
  0xb3   : > { %v4543_v49 = vpop.f32.mrf.mxu0  ;;  %v1415_v54 = vpop.f32.mrf.mxu2  ;;  %2664 = vmatpush.bf16.msra.mxu2 %v3903_v13 }
  0xb4   : > { %v1439_v56 = vpop.f32.mrf.mxu3  ;;  %v1393_v60 = vpop.f32.mrf.mxu1  ;;  %v1416_v25 = vadd.f32 %v1415_v54, %v1392_v23  ;;  %v1641_v54 = vsel %vm4590_vm3, 0, %v1640_v48  ;;  %v3922_v48 = vld [vmem:[%s5099_s4 + $0xf8] sm:$0xff] }
  0xb5   : > { %v1394_v16 = vadd.f32 %v1393_v60, %v4543_v49  ;;  %v3911_v60 = vld [vmem:[%s5099_s4 + $0xa0] sm:$0xff]  ;;  %1642 = vst [vmem:[#allocation2 + $0x10] sm:$0x1] %v1641_v54 }
  0xb6   : > { %v1440_v39 = vadd.f32 %v1439_v56, %v1416_v25  ;;  %v1660_v56 = vld [vmem:[#allocation2 + $0x14] sm:$0x1]  ;;  %2683 = vmatpush.bf16.msra.mxu3 %v3911_v60  ;;  %v4687_v25 = vstv %s3464_s30  ;;  %s379_s30 = sadd.s32 %s3082_s24, %s5139_s26 }
  0xb7   : > { %vm1607_vm5 = vcmp.ge.s32.totalorder %v4687_v25, 0  ;;  %vm1613_vm6 = vcmp.lt.s32.totalorder %v4687_v25, 8  ;;  %v1602_v29 = vadd.s32 1, %v4687_v25  ;;  %s3083_s19 = sshll.u32 %s379_s30, 2 }
  0xb8   : > { %vm4725_vm7 = vmand %vm1607_vm5, %vm1613_vm6  ;;  %s381_s12 = scalar_lea.vmem %s5105_s10, %s3083_s19 }
  0xb9   : > { %vm1608_vm9 = vcmp.ge.s32.totalorder %v1602_v29, 0  ;;  %vm1614_vm10 = vcmp.lt.s32.totalorder %v1602_v29, 8  ;;  %v3937_v29 = vld [vmem:[%s5099_s4 + $0x170] sm:$0xff] }
  0xba   : > { %vm4778_vm12 = vmand %vm1608_vm9, %vm1614_vm10 }
  0xbb   : > { %v4545_v55 = vpop.f32.mrf.mxu0  ;;  %v4549_v63 = vpop.f32.mrf.mxu2 }
  0xbc   : > { %v4551_v0 = vpop.f32.mrf.mxu3  ;;  %v4555_v2 = vpop.f32.mrf.mxu1  ;;  %v1418_v46 = vadd.f32 %v4549_v63, %v1394_v16  ;;  %v3943_v16 = vld [vmem:[%s5099_s4 + $0x1a0] sm:$0xff] }
  0xbd   : > { %v1397_v63 = vadd.f32 %v4555_v2, %v4545_v55  ;;  %2759 = vmatpush.bf16.msrb.mxu0 %v3943_v16 }
  0xbe   : > { %v1442_v49 = vadd.f32 %v4551_v0, %v1418_v46  ;;  %v1661_v0 = vsel %vm4597_vm4, 0, %v1660_v56  ;;  %v1649_v46 = vld [vmem:[#allocation2 + $0x28] sm:$0x1] }
  0xbf   : > { %1662 = vst [vmem:[#allocation2 + $0x14] sm:$0x1] %v1661_v0 }
  0xc3   : > { %v4547_v59 = vpop.f32.mrf.mxu0  ;;  %v4557_v35 = vpop.f32.mrf.mxu2 }
  0xc4   : > { %v4559_v52 = vpop.f32.mrf.mxu3  ;;  %v4563_v32 = vpop.f32.mrf.mxu1  ;;  %v1421_v55 = vadd.f32 %v4557_v35, %v1397_v63  ;;  %v3892_v35 = vld [vmem:[%s5099_s4 + $0x8] sm:$0xff] }
  0xc5   : > { %2648 = vmatpush.bf16.msra.mxu1 %v3892_v35  ;;  %v1399_v62 = vadd.f32 %v4563_v32, %v4547_v59  ;;  %v3891_v32 = vld [vmem:[%s5099_s4] sm:$0xff] }
  0xc6   : > { %v1445_v26 = vadd.f32 %v4559_v52, %v1421_v55  ;;  %v3902_v52 = vld [vmem:[%s5099_s4 + $0x58] sm:$0xff]  ;;  %v1647_v55 = vsel %vm4590_vm3, 0, %v1646_v8 }
  0xc7   : > { %2665 = vmatpush.bf16.msra.mxu2 %v3902_v52  ;;  %1648 = vst [vmem:[#allocation2 + $0x20] sm:$0x1] %v1647_v55 }
  0xc9   : > { %2649 = vmatpush.bf16.msra.mxu1 %v3891_v32 }
  0xcb   : > { %v4553_v1 = vpop.f32.mrf.mxu0  ;;  %v4565_v41 = vpop.f32.mrf.mxu2 }
  0xcc   : > { %v4567_v43 = vpop.f32.mrf.mxu3  ;;  %v4569_v4 = vpop.f32.mrf.mxu1 }
  0xcd   : > { %v1402_v54 = vadd.f32 %v4569_v4, %v4553_v1  ;;  %2699 = vmatpush.bf16.msrb.mxu1 %v3922_v48  ;;  %v3907_v4 = vld [vmem:[%s5099_s4 + $0x80] sm:$0xff] }
  0xd3   : > { %v4561_v3 = vpop.f32.mrf.mxu0  ;;  %v4571_v57 = vpop.f32.mrf.mxu2 }
  0xd4   : > { %v4575_v5 = vpop.f32.mrf.mxu3  ;;  %v4579_v45 = vpop.f32.mrf.mxu1 }
  0xdb   : > { %v1463_v33 = vpop.f32.mrf.mxu0  ;;  %v4581_v6 = vpop.f32.mrf.mxu2 }
  0xdc   : > { %v4583_v7 = vpop.f32.mrf.mxu3  ;;  %v1487_v10 = vpop.f32.mrf.mxu1  ;;  %v1464_v44 = vadd.f32 %v1463_v33, %v1440_v39  ;;  %v1644_v39 = vsel %vm4590_vm3, 0, %v1643_v34 }
  0xdd   : > { %1645 = vst [vmem:[#allocation2 + $0x18] sm:$0x1] %v1644_v39 }
  0xde   : > { %v1488_v28 = vadd.f32 %v1487_v10, %v1464_v44 }
  0xe3   : > { %v4573_v42 = vpop.f32.mrf.mxu0  ;;  %v1511_v14 = vpop.f32.mrf.mxu2 }
  0xe4   : > { %v1535_v27 = vpop.f32.mrf.mxu3  ;;  %v1489_v51 = vpop.f32.mrf.mxu1  ;;  %v1512_v33 = vadd.f32 %v1511_v14, %v1488_v28  ;;  %v1466_v10 = vadd.f32 %v4573_v42, %v1442_v49  ;;  %v3910_v14 = vld [vmem:[%s5099_s4 + $0x98] sm:$0xff] }
  0xe5   : > { %2684 = vmatpush.bf16.msra.mxu3 %v3910_v14  ;;  %v3942_v49 = vld [vmem:[%s5099_s4 + $0x198] sm:$0xff]  ;;  %v3921_v14 = vld [vmem:[%s5099_s4 + $0xf0] sm:$0xff] }
  0xe6   : > { %v1536_v42 = vadd.f32 %v1535_v27, %v1512_v33  ;;  %v1490_v23 = vadd.f32 %v1489_v51, %v1466_v10  ;;  %v1664_v51 = vsel %vm4597_vm4, 0, %v1663_v50  ;;  %v1666_v10 = vld [vmem:[#allocation2 + $0x24] sm:$0x1]  ;;  %2760 = vmatpush.bf16.msrb.mxu0 %v3942_v49  ;;  %2700 = vmatpush.bf16.msrb.mxu1 %v3921_v14  ;;  %v1740_v50 = vld [vmem:[#allocation2] sm:$0xf] }
  0xe7   : > { %1665 = vst [vmem:[#allocation2 + $0x1c] sm:$0x1] %v1664_v51  ;;  %v1667_v1 = vsel %vm4597_vm4, 0, %v1666_v10  ;;  %v1743_v51 = vld [vmem:[#allocation2 + $0x4] sm:$0x1] }
  0xe8   : > { %1668 = vst [vmem:[#allocation2 + $0x24] sm:$0x1] %v1667_v1 }
  0xe9   : > { %2685 = vmatpush.bf16.msra.mxu3 %v3909_v61  ;;  %v1603_v61 = vadd.s32 2, %v4687_v25 }
  0xeb   : > { %v4577_v58 = vpop.f32.mrf.mxu0  ;;  %v1513_v17 = vpop.f32.mrf.mxu2  ;;  %vm1609_vm13 = vcmp.ge.s32.totalorder %v1603_v61, 0  ;;  %vm1615_vm14 = vcmp.lt.s32.totalorder %v1603_v61, 8  ;;  %v3935_v61 = vld [vmem:[%s5099_s4 + $0x160] sm:$0xff] }
  0xec   : > { %v4647_v53 = vpop.f32.mrf.mxu3  ;;  %v1492_v2 = vpop.f32.mrf.mxu1  ;;  %v1514_v38 = vadd.f32 %v1513_v17, %v1490_v23  ;;  %v1469_v40 = vadd.f32 %v4577_v58, %v1445_v26  ;;  %v1423_v58 = vadd.f32 %v4565_v41, %v1399_v62  ;;  %v3901_v17 = vld [vmem:[%s5099_s4 + $0x50] sm:$0xff]  ;;  %v3899_v23 = vld [vmem:[%s5099_s4 + $0x40] sm:$0xff]  ;;  %vm4818_vm15 = vmand %vm1609_vm13, %vm1615_vm14 }
  0xed   : > { %2666 = vmatpush.bf16.msra.mxu2 %v3901_v17  ;;  %2686 = vmatpush.bf16.msra.mxu3 %v3908_v37 }
  0xee   : > { %v1538_v47 = vadd.f32 %v4647_v53, %v1514_v38  ;;  %v1493_v21 = vadd.f32 %v1492_v2, %v1469_v40  ;;  %v1447_v53 = vadd.f32 %v4567_v43, %v1423_v58  ;;  %v3900_v43 = vld [vmem:[%s5099_s4 + $0x48] sm:$0xff] }
  0xf1   : > { %2667 = vmatpush.bf16.msra.mxu2 %v3900_v43  ;;  %2687 = vmatpush.bf16.msra.mxu3 %v3907_v4  ;;  %v1746_v43 = vld [vmem:[#allocation2 + $0x8] sm:$0xf]  ;;  %v1749_v4 = vld [vmem:[#allocation2 + $0xc] sm:$0x1] }
  0xf3   : > { %v4588_v9 = vpop.f32.mrf.mxu0  ;;  %v1516_v15 = vpop.f32.mrf.mxu2 }
  0xf4   : > { %v1540_v36 = vpop.f32.mrf.mxu3  ;;  %v1494_v41 = vpop.f32.mrf.mxu1  ;;  %v1517_v60 = vadd.f32 %v1516_v15, %v1493_v21  ;;  %v1471_v2 = vadd.f32 %v4588_v9, %v1447_v53  ;;  %v1426_v15 = vadd.f32 %v4571_v57, %v1402_v54  ;;  %v3938_v57 = vld [vmem:[%s5099_s4 + $0x178] sm:$0xff]  ;;  %v3919_v53 = vld [vmem:[%s5099_s4 + $0xe0] sm:$0xff] }
  0xf5   : > { %2737 = vmatpush.bf16.msrb.mxu3 %v3938_v57  ;;  %2668 = vmatpush.bf16.msra.mxu2 %v3899_v23  ;;  %v3971_v9 = vld [vmem:[%s5102_s7 + $0x20] sm:$0xff] }
  0xf6   : > { %v1541_v38 = vadd.f32 %v1540_v36, %v1517_v60  ;;  %v1495_v39 = vadd.f32 %v1494_v41, %v1471_v2  ;;  %v1450_v40 = vadd.f32 %v4575_v5, %v1426_v15  ;;  %v3939_v60 = vld [vmem:[%s5099_s4 + $0x180] sm:$0xff] }
  0xf9   : > { %2738 = vmatpush.bf16.msrb.mxu3 %v3937_v29  ;;  %v3916_v29 = vld [vmem:[%s5099_s4 + $0xc8] sm:$0xff] }
  0xfb   : > { %v4612_v30 = vpop.f32.mrf.mxu0  ;;  %v1518_v63 = vpop.f32.mrf.mxu2 }
  0xfc   : > { %v1542_v26 = vpop.f32.mrf.mxu3  ;;  %v1519_v58 = vadd.f32 %v1518_v63, %v1495_v39  ;;  %v1474_v63 = vadd.f32 %v4612_v30, %v1450_v40  ;;  %v3936_v30 = vld [vmem:[%s5099_s4 + $0x168] sm:$0xff] }
  0xfd   : > { %2739 = vmatpush.bf16.msrb.mxu3 %v3936_v30 }
  0xfe   : > { %v1543_v1 = vadd.f32 %v1542_v26, %v1519_v58 }
 0x101   : > { %2740 = vmatpush.bf16.msrb.mxu3 %v3935_v61  ;;  %v3954_v61 = vld [vmem:[%s5099_s4 + $0x1f8] sm:$0xff] }
 0x103   : > { %v4641_v22 = vpop.f32.mrf.mxu0  ;;  %v1521_v48 = vpop.f32.mrf.mxu2 }
 0x10b   : > { %v1559_v24 = vpop.f32.mrf.mxu0 }
 0x10c   : > { %v1560_v27 = vadd.f32 %v1559_v24, %v1536_v42  ;;  %v3941_v42 = vld [vmem:[%s5099_s4 + $0x190] sm:$0xff]  ;;  %v1404_v24 = vadd.f32 %v4579_v45, %v4561_v3  ;;  %v3920_v3 = vld [vmem:[%s5099_s4 + $0xe8] sm:$0xff] }
 0x10d   : > { %2761 = vmatpush.bf16.msrb.mxu0 %v3941_v42  ;;  %v3940_v45 = vld [vmem:[%s5099_s4 + $0x188] sm:$0xff]  ;;  %2701 = vmatpush.bf16.msrb.mxu1 %v3920_v3 }
 0x10e   : > { %v1578_v59 = vmul.f32 %v4679_v19, %v1560_v27  ;;  %v1428_v36 = vadd.f32 %v4581_v6, %v1404_v24  ;;  %v3930_v6 = vld [vmem:[%s5099_s4 + $0x138] sm:$0xff] }
 0x10f   : > { %2718 = vmatpush.bf16.msrb.mxu2 %v3930_v6 }
 0x110   : > { %v1588_v44 = vadd.f32 %v4693_v31, %v1578_v59  ;;  %v1452_v55 = vadd.f32 %v4583_v7, %v1428_v36  ;;  %v3917_v36 = vld [vmem:[%s5099_s4 + $0xd0] sm:$0xff] }
 0x111   : > { %2762 = vmatpush.bf16.msrb.mxu0 %v3940_v45  ;;  %2702 = vmatpush.bf16.msrb.mxu1 %v3919_v53 }
 0x112   : > { %v1594_v28 = vmax.f32 %v1588_v44, 0.0  ;;  %v1497_v44 = vpop.f32.mrf.mxu1  ;;  %v1476_v23 = vadd.f32 %v4641_v22, %v1452_v55  ;;  %v3928_v22 = vld [vmem:[%s5099_s4 + $0x128] sm:$0xff] }
 0x113   : > { %v1561_v56 = vpop.f32.mrf.mxu0 }
 0x114   : > { %v1625_v33 = vsel %vm4725_vm7, %v1594_v28, 0.0  ;;  %v1562_v0 = vadd.f32 %v1561_v56, %v1538_v47  ;;  %v1669_v47 = vld [vmem:[#allocation2 + $0x2c] sm:$0x1]  ;;  %v1650_v28 = vsel %vm4590_vm3, 0, %v1649_v46 }
 0x115   : > { %v1672_v11 = vpack.c.bf16 %v1625_v33, %v1625_v33  ;;  %v1670_v54 = vsel %vm4597_vm4, 0, %v1669_v47  ;;  %1651 = vst [vmem:[#allocation2 + $0x28] sm:$0x1] %v1650_v28  ;;  %2763 = vmatpush.bf16.msrb.mxu0 %v3939_v60  ;;  %v3927_v47 = vld [vmem:[%s5099_s4 + $0x120] sm:$0xff]  ;;  %v1755_v28 = vld [vmem:[#allocation2 + $0x14] sm:$0x1] }
 0x116   : > { %v1579_v13 = vmul.f32 %v4679_v19, %v1562_v0  ;;  %v1604_v0 = vadd.s32 3, %v4687_v25  ;;  %1671 = vst [vmem:[#allocation2 + $0x2c] sm:$0x1] %v1670_v54 }
 0x117   : > { %v1679_v35 = vshrl.u32 %v1672_v11, 16  ;;  %v1682_v34 = vshll.u32 %v1672_v11, 16  ;;  %v3929_v11 = vld [vmem:[%s5099_s4 + $0x130] sm:$0xff] }
 0x118   : > { %v1589_v20 = vadd.f32 %v4693_v31, %v1579_v13  ;;  %v1545_v13 = vpop.f32.mrf.mxu3  ;;  %2719 = vmatpush.bf16.msrb.mxu2 %v3929_v11  ;;  %vm1610_vm0 = vcmp.ge.s32.totalorder %v1604_v0, 0  ;;  %vm1616_vm1 = vcmp.lt.s32.totalorder %v1604_v0, 8 }
 0x119   : > { %v1681_v27 = vrot.slane %v1679_v35, 7  ;;  %v3918_v35 = vld [vmem:[%s5099_s4 + $0xd8] sm:$0xff]  ;;  %vm4856_vm2 = vmand %vm1610_vm0, %vm1616_vm1 }
 0x11a   : > { %v1595_v52 = vmax.f32 %v1589_v20, 0.0  ;;  %v1498_v20 = vadd.f32 %v1497_v44, %v1474_v63  ;;  %2703 = vmatpush.bf16.msrb.mxu1 %v3918_v35  ;;  %v3933_v35 = vld [vmem:[%s5099_s4 + $0x150] sm:$0xff] }
 0x11b   : > { %v1684_v59 = vor.u32 %v1682_v34, %v1681_v27  ;;  %v1685_v32 = vrot.slane %v1681_v27, 4  ;;  %v1564_v16 = vpop.f32.mrf.mxu0 }
 0x11c   : > { %v1626_v17 = vsel %vm4778_vm12, %v1595_v52, 0.0  ;;  %v1565_v37 = vadd.f32 %v1564_v16, %v1541_v38  ;;  %v1522_v62 = vadd.f32 %v1521_v48, %v1498_v20  ;;  %v1499_v38 = vpop.f32.mrf.mxu1  ;;  %2720 = vmatpush.bf16.msrb.mxu2 %v3928_v22  ;;  %v1605_v16 = vadd.s32 4, %v4687_v25  ;;  %v3915_v20 = vld [vmem:[%s5099_s4 + $0xc0] sm:$0xff] }
 0x11d   : > { %v1741_v21 = vsel %vm4763_vm11, %v1684_v59, %v1740_v50  ;;  %v1744_v5 = vsel %vm4590_vm3, %v1685_v32, %v1743_v51  ;;  %v1673_v41 = vpack.c.bf16 %v1626_v17, %v1626_v17  ;;  %v1523_v59 = vpop.f32.mrf.mxu2  ;;  %v1500_v58 = vadd.f32 %v1499_v38, %v1476_v23  ;;  %v1758_v23 = vld [vmem:[#allocation2 + $0x18] sm:$0xf] }
 0x11e   : > { %1742 = vst [vmem:[#allocation2] sm:$0xf] %v1741_v21  ;;  %v1580_v49 = vmul.f32 %v4679_v19, %v1565_v37  ;;  %v3934_v21 = vld [vmem:[%s5099_s4 + $0x158] sm:$0xff]  ;;  %2704 = vmatpush.bf16.msrb.mxu1 %v3917_v36  ;;  %vm1611_vm4 = vcmp.ge.s32.totalorder %v1605_v16, 0  ;;  %vm1617_vm5 = vcmp.lt.s32.totalorder %v1605_v16, 8  ;;  %v3953_v37 = vld [vmem:[%s5099_s4 + $0x1f0] sm:$0xff] }
 0x11f   : > { %1745 = vst [vmem:[#allocation2 + $0x4] sm:$0x1] %v1744_v5  ;;  %v1687_v56 = vshrl.u32 %v1673_v41, 16  ;;  %v1690_v8 = vshll.u32 %v1673_v41, 16  ;;  %v1546_v5 = vadd.f32 %v1545_v13, %v1522_v62  ;;  %v1752_v41 = vld [vmem:[#allocation2 + $0x10] sm:$0xf]  ;;  %v1524_v48 = vadd.f32 %v1523_v59, %v1500_v58  ;;  %2741 = vmatpush.bf16.msrb.mxu3 %v3934_v21  ;;  %vm4897_vm6 = vmand %vm1611_vm4, %vm1617_vm5 }
 0x120   : > { %v1590_v33 = vadd.f32 %v4693_v31, %v1580_v49  ;;  %2721 = vmatpush.bf16.msrb.mxu2 %v3927_v47  ;;  %v1547_v0 = vpop.f32.mrf.mxu3  ;;  %v3926_v13 = vld [vmem:[%s5099_s4 + $0x118] sm:$0xff] }
 0x121   : > { %v1689_v18 = vrot.slane %v1687_v56, 7 }
 0x122   : > { %v1596_v2 = vmax.f32 %v1590_v33, 0.0  ;;  %2705 = vmatpush.bf16.msrb.mxu1 %v3916_v29 }
 0x123   : > { %v1692_v14 = vor.u32 %v1690_v8, %v1689_v18  ;;  %v1693_v42 = vrot.slane %v1689_v18, 4  ;;  %v1566_v15 = vpop.f32.mrf.mxu0  ;;  %2742 = vmatpush.bf16.msrb.mxu3 %v3933_v35 }
 0x124   : > { %v1627_v7 = vsel %vm4818_vm15, %v1596_v2, 0.0  ;;  %v1567_v57 = vadd.f32 %v1566_v15, %v1543_v1  ;;  %2722 = vmatpush.bf16.msrb.mxu2 %v3926_v13 }
 0x125   : > { %v1747_v24 = vsel %vm4763_vm11, %v1692_v14, %v1746_v43  ;;  %v1750_v26 = vsel %vm4590_vm3, %v1693_v42, %v1749_v4  ;;  %v1674_v27 = vpack.c.bf16 %v1627_v7, %v1627_v7  ;;  %v4839_v34 = vld [vmem:[#allocation2] sm:$0xf]  ;;  %v4880_v4 = vadd.s32 5, %v4687_v25 }
 0x126   : > { %v1784_v50 = vld [vmem:[#allocation2] sm:$0xe]  ;;  %1748 = vst [vmem:[#allocation2 + $0x8] sm:$0xf] %v1747_v24  ;;  %v1581_v39 = vmul.f32 %v4679_v19, %v1567_v57  ;;  %v1780_v51 = vld [vmem:[#allocation2 + $0x4] sm:$0x1]  ;;  %v1822_v52 = vunpack.c.l.b16 %v4839_v34  ;;  %v1548_v25 = vadd.f32 %v1547_v0, %v1524_v48  ;;  %2706 = vmatpush.bf16.msrb.mxu1 %v3915_v20 }
 0x127   : > { %1751 = vst [vmem:[#allocation2 + $0xc] sm:$0x1] %v1750_v26  ;;  %v1695_v3 = vshrl.u32 %v1674_v27, 16  ;;  %v1823_v45 = vunpack.c.l.b16 %v1780_v51  ;;  %v1866_v40 = vunpack.c.l.b16 %v1784_v50  ;;  %v1698_v17 = vshll.u32 %v1674_v27, 16  ;;  %v3925_v26 = vld [vmem:[%s5099_s4 + $0x110] sm:$0xff] }
 0x128   : > { %v1591_v32 = vadd.f32 %v4693_v31, %v1581_v39  ;;  %v1761_v50 = vld [vmem:[#allocation2 + $0x1c] sm:$0x1]  ;;  %v3932_v39 = vld [vmem:[%s5099_s4 + $0x148] sm:$0xff]  ;;  %vm1612_vm7 = vcmp.ge.s32.totalorder %v4880_v4, 0  ;;  %vm1618_vm8 = vcmp.lt.s32.totalorder %v4880_v4, 8  ;;  %2723 = vmatpush.bf16.msrb.mxu2 %v3925_v26 }
 0x129   : > { %v1697_v44 = vrot.slane %v1695_v3, 7  ;;  %v4860_v46 = vpack.c.b16 %v1823_v45, %v1822_v52  ;;  %v1870_v53 = vpack.c.b16 %v1823_v45, %v1866_v40  ;;  %2743 = vmatpush.bf16.msrb.mxu3 %v3932_v39  ;;  %vm4931_vm9 = vmand %vm1612_vm7, %vm1618_vm8 }
 0x12a   : > { %v1597_v6 = vmax.f32 %v1591_v32, 0.0 }
 0x12b   : > { %v1700_v49 = vor.u32 %v1698_v17, %v1697_v44  ;;  %v1701_v54 = vrot.slane %v1697_v44, 4  ;;  %v1569_v56 = vpop.f32.mrf.mxu0  ;;  %v1837_v33 = vshll.u32 %v4860_v46, 16  ;;  %v1874_v15 = vrot.slane %v1870_v53, 1  ;;  %v3924_v17 = vld [vmem:[%s5099_s4 + $0x108] sm:$0xff] }
 0x12c   : > { %v1628_v60 = vsel %vm4856_vm2, %v1597_v6, 0.0  ;;  %v1570_v63 = vadd.f32 %v1569_v56, %v1546_v5  ;;  %v3931_v6 = vld [vmem:[%s5099_s4 + $0x140] sm:$0xff]  ;;  %2724 = vmatpush.bf16.msrb.mxu2 %v3924_v17 }
 0x12d   : > { %v1753_v18 = vsel %vm4763_vm11, %v1700_v49, %v1752_v41  ;;  %v1756_v8 = vsel %vm4590_vm3, %v1701_v54, %v1755_v28  ;;  %v1675_v10 = vpack.c.bf16 %v1628_v60, %v1628_v60  ;;  %v1777_v11 = vld [vmem:[#allocation2 + $0x8] sm:$0xf]  ;;  %v1839_v24 = vrot.slane %v1837_v33, 1  ;;  %2744 = vmatpush.bf16.msrb.mxu3 %v3931_v6 }
 0x12e   : > { %v1785_v30 = vld [vmem:[#allocation2 + $0x8] sm:$0xe]  ;;  %1754 = vst [vmem:[#allocation2 + $0x10] sm:$0xf] %v1753_v18  ;;  %v1582_v55 = vmul.f32 %v4679_v19, %v1570_v63  ;;  %v1781_v1 = vld [vmem:[#allocation2 + $0xc] sm:$0x1]  ;;  %v1824_v43 = vunpack.c.l.b16 %v1777_v11  ;;  %v2007_v32 = vunpack.c.l.b16 %v1874_v15 }
 0x12f   : > { %v1867_v2 = vunpack.c.l.b16 %v1785_v30  ;;  %1757 = vst [vmem:[#allocation2 + $0x14] sm:$0x1] %v1756_v8  ;;  %v1703_v14 = vshrl.u32 %v1675_v10, 16  ;;  %v1825_v42 = vunpack.c.l.b16 %v1781_v1  ;;  %v1706_v34 = vshll.u32 %v1675_v10, 16  ;;  %v3923_v8 = vld [vmem:[%s5099_s4 + $0x100] sm:$0xff] }
 0x130   : > { %v1592_v7 = vadd.f32 %v4693_v31, %v1582_v55  ;;  %v2174_v57 = vpack.c.b16 %v1824_v43, %v1822_v52  ;;  %v1835_v52 = vshrl.u32 %v4860_v46, 16  ;;  %v1764_v30 = vld [vmem:[#allocation2 + $0x20] sm:$0xf]  ;;  %v3952_v55 = vld [vmem:[%s5099_s4 + $0x1e8] sm:$0xff]  ;;  %v1767_v1 = vld [vmem:[#allocation2 + $0x24] sm:$0x1]  ;;  %2725 = vmatpush.bf16.msrb.mxu2 %v3923_v8 }
 0x131   : > { %v1705_v27 = vrot.slane %v1703_v14, 7  ;;  %v1831_v62 = vpack.c.b16 %v1825_v42, %v1824_v43  ;;  %v1871_v38 = vpack.c.b16 %v1825_v42, %v1867_v2 }
 0x132   : > { %v1598_v51 = vmax.f32 %v1592_v7, 0.0  ;;  %2650 = vmatmul.bf16.vlgmr.msra.gmra.mxu1 %v2174_v57  ;;  %v1840_v58 = vor.u32 %v1839_v24, %v1835_v52 }
 0x133   : > { %v1708_v3 = vor.u32 %v1706_v34, %v1705_v27  ;;  %v1709_v45 = vrot.slane %v1705_v27, 4  ;;  %v1571_v40 = vpop.f32.mrf.mxu0  ;;  %v1875_v59 = vrot.slane %v1871_v38, 1  ;;  %v1844_v44 = vshll.u32 %v1831_v62, 16  ;;  %2775 = vmatpush.bf16.msra.mxu1 %v3954_v61  ;;  %v3962_v61 = vld [vmem:[%s5099_s4 + $0x238] sm:$0xff] }
 0x134   : > { %v1629_v16 = vsel %vm4897_vm6, %v1598_v51, 0.0  ;;  %v1572_v36 = vadd.f32 %v1571_v40, %v1548_v25  ;;  %v1842_v48 = vshrl.u32 %v1831_v62, 16  ;;  %v2006_v4 = vunpack.c.l.b16 %v1840_v58 }
 0x135   : > { %v1759_v46 = vsel %vm4763_vm11, %v1708_v3, %v1758_v23  ;;  %v1762_v47 = vsel %vm4590_vm3, %v1709_v45, %v1761_v50  ;;  %v1676_v21 = vpack.c.bf16 %v1629_v16, %v1629_v16  ;;  %v2013_v5 = vunpack.c.l.b16 %v1875_v59  ;;  %v1778_v41 = vld [vmem:[#allocation2 + $0x10] sm:$0xf] }
 0x136   : > { %v1786_v28 = vld [vmem:[#allocation2 + $0x10] sm:$0xe]  ;;  %1760 = vst [vmem:[#allocation2 + $0x18] sm:$0xf] %v1759_v46  ;;  %v1583_v29 = vmul.f32 %v4679_v19, %v1572_v36  ;;  %v1846_v49 = vrot.slane %v1844_v44, 1  ;;  %v1826_v56 = vunpack.c.l.b16 %v1778_v41  ;;  %v3951_v36 = vld [vmem:[%s5099_s4 + $0x1e0] sm:$0xff] }
 0x137   : > { %v1782_v54 = vld [vmem:[#allocation2 + $0x14] sm:$0x1]  ;;  %1763 = vst [vmem:[#allocation2 + $0x1c] sm:$0x1] %v1762_v47  ;;  %v1711_v53 = vshrl.u32 %v1676_v21, 16  ;;  %v2176_v60 = vpack.c.b16 %v2013_v5, %v2007_v32  ;;  %v1868_v19 = vunpack.c.l.b16 %v1786_v28  ;;  %2776 = vmatpush.bf16.msra.mxu1 %v3953_v37  ;;  %v1714_v11 = vshll.u32 %v1676_v21, 16 }
 0x138   : > { %v1827_v63 = vunpack.c.l.b16 %v1782_v54  ;;  %v1593_v33 = vadd.f32 %v4693_v31, %v1583_v29  ;;  %v1847_v18 = vor.u32 %v1846_v49, %v1842_v48  ;;  %v3974_v31 = vld [vmem:[%s5102_s7 + $0x38] sm:$0xff]  ;;  %v4946_v14 = vld [vmem:[#allocation2 + $0x10] sm:$0xf]  ;;  %v4969_v32 = vld [vmem:[#allocation2 + $0x8] sm:$0xf] }
 0x139   : > { %v1713_v10 = vrot.slane %v1711_v53, 7  ;;  %2688 = vmatmul.bf16.vlgmr.msra.gmra.mxu3 %v2176_v60  ;;  %v1950_v27 = vunpack.c.l.b16 %v4946_v14  ;;  %v3973_v3 = vld [vmem:[%s5102_s7 + $0x30] sm:$0xff]  ;;  %v3972_v21 = vld [vmem:[%s5102_s7 + $0x28] sm:$0xff]  ;;  %v1886_v54 = vunpack.c.l.b16 %v4969_v32 }
 0x13a   : > { %v1599_v43 = vmax.f32 %v1593_v33, 0.0  ;;  %v2012_v2 = vunpack.c.l.b16 %v1847_v18  ;;  %v4944_v13 = vpack.c.b16 %v1827_v63, %v1826_v56  ;;  %2912 = vmatpush.bf16.msra.mxu3 %v3974_v31  ;;  %v1872_v25 = vpack.c.b16 %v1827_v63, %v1868_v19  ;;  %v4971_v16 = vld [vmem:[#allocation2 + $0x10] sm:$0xf]  ;;  %v1794_v46 = vld [vmem:[#allocation2 + $0x14] sm:$0x1] }
 0x13b   : > { %v1716_v42 = vor.u32 %v1714_v11, %v1713_v10  ;;  %v1717_v15 = vrot.slane %v1713_v10, 4  ;;  %2777 = vmatpush.bf16.msra.mxu1 %v3952_v55  ;;  %v3961_v47 = vld [vmem:[%s5099_s4 + $0x230] sm:$0xff]  ;;  %v1770_v5 = vld [vmem:[#allocation2 + $0x28] sm:$0xf]  ;;  %v1773_v41 = vld [vmem:[#allocation2 + $0x2c] sm:$0x1]  ;;  %v1888_v63 = vunpack.c.l.b16 %v4971_v16  ;;  %v1889_v33 = vunpack.c.l.b16 %v1794_v46 }
 0x13c   : > { %v1630_v35 = vsel %vm4931_vm9, %v1599_v43, 0.0  ;;  %v2175_v20 = vpack.c.b16 %v2012_v2, %v2006_v4  ;;  %v1851_v39 = vshll.u32 %v4944_v13, 16  ;;  %v1876_v59 = vrot.slane %v1872_v25, 1  ;;  %v1793_v49 = vld [vmem:[#allocation2 + $0xc] sm:$0x1]  ;;  %v3949_v2 = vld [vmem:[%s5099_s4 + $0x1d0] sm:$0xff] }
 0x13d   : > { %v1765_v23 = vsel %vm4763_vm11, %v1716_v42, %v1764_v30  ;;  %v1768_v7 = vsel %vm4590_vm3, %v1717_v15, %v1767_v1  ;;  %v1677_v57 = vpack.c.bf16 %v1630_v35, %v1630_v35  ;;  %v1779_v24 = vld [vmem:[#allocation2 + $0x18] sm:$0xf]  ;;  %v1849_v53 = vshrl.u32 %v4944_v13, 16  ;;  %v1798_v0 = vld [vmem:[#allocation2 + $0x10] sm:$0xe]  ;;  %v3960_v30 = vld [vmem:[%s5099_s4 + $0x228] sm:$0xff] }
 0x13e   : > { %v4954_v26 = vld [vmem:[#allocation2 + $0x18] sm:$0xf]  ;;  %1766 = vst [vmem:[#allocation2 + $0x20] sm:$0xf] %v1765_v23  ;;  %2669 = vmatmul.bf16.vlgmr.msra.gmra.mxu2 %v2175_v20  ;;  %v1783_v50 = vld [vmem:[#allocation2 + $0x1c] sm:$0x1]  ;;  %v1828_v22 = vunpack.c.l.b16 %v1779_v24  ;;  %2913 = vmatpush.bf16.msra.mxu3 %v3973_v3  ;;  %v2019_v8 = vunpack.c.l.b16 %v1876_v59  ;;  %v1887_v43 = vunpack.c.l.b16 %v1793_v49  ;;  %v1931_v4 = vunpack.c.l.b16 %v1798_v0 }
 0x13f   : > { %v1787_v34 = vld [vmem:[#allocation2 + $0x18] sm:$0xe]  ;;  %v1952_v62 = vunpack.c.l.b16 %v4954_v26  ;;  %1769 = vst [vmem:[#allocation2 + $0x24] sm:$0x1] %v1768_v7  ;;  %v1719_v51 = vshrl.u32 %v1677_v57, 16  ;;  %v1829_v52 = vunpack.c.l.b16 %v1783_v50  ;;  %v1722_v44 = vshll.u32 %v1677_v57, 16  ;;  %2794 = vmatpush.bf16.msra.mxu2 %v3962_v61  ;;  %2778 = vmatpush.bf16.msra.mxu1 %v3951_v36 }
 0x140   : > { %v1869_v38 = vunpack.c.l.b16 %v1787_v34  ;;  %v2183_v45 = vpack.c.b16 %v1828_v22, %v1826_v56  ;;  %v1853_v28 = vrot.slane %v1851_v39, 1  ;;  %v3950_v56 = vld [vmem:[%s5099_s4 + $0x1d8] sm:$0xff]  ;;  %v1797_v11 = vld [vmem:[#allocation2 + $0x8] sm:$0xe]  ;;  %v1895_v42 = vpack.c.b16 %v1889_v33, %v1888_v63  ;;  %v3959_v35 = vld [vmem:[%s5099_s4 + $0x220] sm:$0xff] }
 0x141   : > { %v2180_v40 = vpack.c.b16 %v1952_v62, %v1950_v27  ;;  %v1721_v58 = vrot.slane %v1719_v51, 7  ;;  %v1833_v17 = vpack.c.b16 %v1829_v52, %v1828_v22  ;;  %v1930_v15 = vunpack.c.l.b16 %v1797_v11  ;;  %v3970_v7 = vld [vmem:[%s5102_s7 + $0x18] sm:$0xff]  ;;  %v3948_v34 = vld [vmem:[%s5099_s4 + $0x1c8] sm:$0xff]  ;;  %v3947_v59 = vld [vmem:[%s5099_s4 + $0x1c0] sm:$0xff] }
 0x142   : > { %v1873_v37 = vpack.c.b16 %v1829_v52, %v1869_v38  ;;  %2655 = vmatmul.bf16.gmra.mxu1 %v2183_v45  ;;  %2914 = vmatpush.bf16.msra.mxu3 %v3972_v21  ;;  %v1854_v31 = vor.u32 %v1853_v28, %v1849_v53  ;;  %v1894_v23 = vpack.c.b16 %v1887_v43, %v1886_v54  ;;  %v1908_v22 = vshll.u32 %v1895_v42, 16  ;;  %v3958_v3 = vld [vmem:[%s5099_s4 + $0x218] sm:$0xff]  ;;  %v3968_v28 = vld [vmem:[%s5102_s7 + $0x8] sm:$0xff]  ;;  %v3967_v11 = vld [vmem:[%s5102_s7] sm:$0xff] }
 0x143   : > { %2764 = vmatmul.bf16.vlgmr.msrb.gmra.mxu0 %v2180_v40  ;;  %v1724_v6 = vor.u32 %v1722_v44, %v1721_v58  ;;  %v1725_v29 = vrot.slane %v1721_v58, 4  ;;  %v1858_v60 = vshll.u32 %v1833_v17, 16  ;;  %2795 = vmatpush.bf16.msra.mxu2 %v3961_v47  ;;  %v1856_v55 = vshrl.u32 %v1833_v17, 16  ;;  %v3969_v40 = vld [vmem:[%s5102_s7 + $0x10] sm:$0xff] }
 0x144   : > { %v1877_v48 = vrot.slane %v1873_v37, 1  ;;  %2779 = vmatpush.bf16.msra.mxu1 %v3950_v56  ;;  %v2018_v20 = vunpack.c.l.b16 %v1854_v31  ;;  %v1935_v24 = vpack.c.b16 %v1889_v33, %v1931_v4  ;;  %v1934_v39 = vpack.c.b16 %v1887_v43, %v1930_v15  ;;  %v3957_v37 = vld [vmem:[%s5099_s4 + $0x210] sm:$0xff]  ;;  %v5035_v56 = vld [vmem:[#allocation2 + $0x1c] sm:$0x1]  ;;  %v3955_v43 = vld [vmem:[%s5099_s4 + $0x200] sm:$0xff] }
 0x145   : > { %v1771_v18 = vsel %vm4763_vm11, %v1724_v6, %v1770_v5  ;;  %v1774_v19 = vsel %vm4590_vm3, %v1725_v29, %v1773_v41  ;;  %v1860_v1 = vrot.slane %v1858_v60, 1  ;;  %v5007_v57 = vld [vmem:[#allocation2 + $0x20] sm:$0xf]  ;;  %v1901_v61 = vshll.u32 %v1894_v23, 16  ;;  %v1791_v5 = vld [vmem:[#allocation2 + $0x18] sm:$0xf] }
 0x146   : > { %v2025_v10 = vunpack.c.l.b16 %v1877_v48  ;;  %1772 = vst [vmem:[#allocation2 + $0x28] sm:$0xf] %v1771_v18  ;;  %2915 = vmatpush.bf16.msra.mxu3 %v3971_v9  ;;  %v1954_v51 = vunpack.c.l.b16 %v5007_v57  ;;  %v1939_v45 = vrot.slane %v1935_v24, 1  ;;  %v2177_v32 = vpack.c.b16 %v1888_v63, %v1886_v54  ;;  %v1792_v44 = vld [vmem:[#allocation2 + $0x20] sm:$0xf]  ;;  %v3956_v60 = vld [vmem:[%s5099_s4 + $0x208] sm:$0xff] }
 0x147   : > { %1775 = vst [vmem:[#allocation2 + $0x2c] sm:$0x1] %v1774_v19  ;;  %v1861_v13 = vor.u32 %v1860_v1, %v1856_v55  ;;  %2796 = vmatpush.bf16.msra.mxu2 %v3960_v30  ;;  %v1910_v36 = vrot.slane %v1908_v22, 1  ;;  %v1938_v58 = vrot.slane %v1934_v39, 1  ;;  %v1796_v17 = vld [vmem:[#allocation2 + $0x24] sm:$0x1]  ;;  %v1892_v48 = vunpack.c.l.b16 %v1792_v44 }
 0x148   : > { %v2185_v12 = vpack.c.b16 %v2025_v10, %v2019_v8  ;;  %2780 = vmatpush.bf16.msra.mxu1 %v3949_v2  ;;  %v1903_v46 = vrot.slane %v1901_v61, 1  ;;  %v1906_v47 = vshrl.u32 %v1895_v42, 16  ;;  %v2015_v21 = vunpack.c.l.b16 %v1939_v45  ;;  %v1795_v41 = vld [vmem:[#allocation2 + $0x1c] sm:$0x1]  ;;  %v1800_v54 = vld [vmem:[#allocation2 + $0x20] sm:$0xe] }
 0x149   : > { %v2024_v25 = vunpack.c.l.b16 %v1861_v13  ;;  %v1899_v6 = vshrl.u32 %v1894_v23, 16  ;;  %v1893_v49 = vunpack.c.l.b16 %v1796_v17  ;;  %v2009_v53 = vunpack.c.l.b16 %v1938_v58  ;;  %v1799_v18 = vld [vmem:[#allocation2 + $0x18] sm:$0xe]  ;;  %v5040_v19 = vld [vmem:[#allocation2 + $0x14] sm:$0x1] }
 0x14a   : > { %2693 = vmatmul.bf16.gmra.mxu3 %v2185_v12  ;;  %v1911_v29 = vor.u32 %v1910_v36, %v1906_v47  ;;  %v1890_v33 = vunpack.c.l.b16 %v1791_v5  ;;  %v1891_v0 = vunpack.c.l.b16 %v1795_v41  ;;  %v1933_v10 = vunpack.c.l.b16 %v1800_v54  ;;  %v1810_v41 = vld [vmem:[#allocation2 + $0x10] sm:$0xe] }
 0x14b   : > { %v2184_v50 = vpack.c.b16 %v2024_v25, %v2018_v20  ;;  %2797 = vmatpush.bf16.msra.mxu2 %v3959_v35  ;;  %2916 = vmatpush.bf16.msra.mxu3 %v3970_v7  ;;  %v1904_v63 = vor.u32 %v1903_v46, %v1899_v6  ;;  %v2179_v8 = vpack.c.b16 %v2015_v21, %v2009_v53  ;;  %v1953_v30 = vunpack.c.l.b16 %v5035_v56  ;;  %v1811_v46 = vld [vmem:[#allocation2 + $0x18] sm:$0xe] }
 0x14c   : > { %2781 = vmatpush.bf16.msra.mxu1 %v3948_v34  ;;  %v2014_v31 = vunpack.c.l.b16 %v1911_v29  ;;  %v1897_v55 = vpack.c.b16 %v1893_v49, %v1892_v48  ;;  %v1932_v1 = vunpack.c.l.b16 %v1799_v18  ;;  %v1951_v9 = vunpack.c.l.b16 %v5040_v19 }
 0x14d   : > { %v5012_v38 = vld [vmem:[#allocation2 + $0x28] sm:$0xf]  ;;  %v2008_v12 = vunpack.c.l.b16 %v1904_v63  ;;  %v1896_v4 = vpack.c.b16 %v1891_v0, %v1890_v33  ;;  %v1937_v2 = vpack.c.b16 %v1893_v49, %v1933_v10  ;;  %v1959_v13 = vpack.c.b16 %v1953_v30, %v1952_v62 }
 0x14e   : > { %2674 = vmatmul.bf16.gmra.mxu2 %v2184_v50  ;;  %v1956_v52 = vunpack.c.l.b16 %v5012_v38  ;;  %v1922_v15 = vshll.u32 %v1897_v55, 16  ;;  %v1936_v35 = vpack.c.b16 %v1891_v0, %v1932_v1  ;;  %v1958_v20 = vpack.c.b16 %v1951_v9, %v1950_v27  ;;  %v3965_v0 = vld [vmem:[%s4203_s25 + $0x12c] sm:$0xf0]  ;;  %v1813_v1 = vld [vmem:[#allocation2 + $0x28] sm:$0xe] }
 0x14f   : > { %2798 = vmatpush.bf16.msra.mxu2 %v3958_v3  ;;  %2917 = vmatpush.bf16.msra.mxu3 %v3969_v40  ;;  %v2178_v42 = vpack.c.b16 %v2014_v31, %v2008_v12  ;;  %v1915_v25 = vshll.u32 %v1896_v4, 16  ;;  %v1941_v23 = vrot.slane %v1937_v2, 1  ;;  %v2186_v7 = vpack.c.b16 %v1892_v48, %v1890_v33  ;;  %v1809_v40 = vld [vmem:[#allocation2 + $0x2c] sm:$0x1]  ;;  %v3762_v33 = vld [vmem:[%s4203_s25 + $0x128] sm:$0xf] }
 0x150   : > { %v2189_v16 = vpack.c.b16 %v1956_v52, %v1954_v51  ;;  %2782 = vmatpush.bf16.msra.mxu1 %v3947_v59  ;;  %v1924_v24 = vrot.slane %v1922_v15, 1  ;;  %v1972_v34 = vshll.u32 %v1959_v13, 16  ;;  %v1940_v50 = vrot.slane %v1936_v35, 1  ;;  %v1812_v12 = vld [vmem:[#allocation2 + $0x20] sm:$0xe] }
 0x151   : > { %v1917_v22 = vrot.slane %v1915_v25, 1  ;;  %v1920_v39 = vshrl.u32 %v1897_v55, 16  ;;  %v1965_v61 = vshll.u32 %v1958_v20, 16  ;;  %v2027_v26 = vunpack.c.l.b16 %v1941_v23  ;;  %v3966_v25 = vld [vmem:[%s4203_s25 + $0x13c] sm:$0xf0] }
 0x152   : > { %2707 = vmatmul.bf16.vlgmr.msrb.gmra.mxu1 %v2177_v32  ;;  %v1913_v62 = vshrl.u32 %v1896_v4, 16  ;;  %v1974_v45 = vrot.slane %v1972_v34, 1  ;;  %v2021_v59 = vunpack.c.l.b16 %v1940_v50  ;;  %v1970_v27 = vshrl.u32 %v1959_v13, 16 }
 0x153   : > { %2769 = vmatmul.bf16.gmra.mxu0 %v2189_v16  ;;  %2799 = vmatpush.bf16.msra.mxu2 %v3957_v37  ;;  %v1925_v3 = vor.u32 %v1924_v24, %v1920_v39  ;;  %v1967_v14 = vrot.slane %v1965_v61, 1  ;;  %v1808_v16 = vld [vmem:[#allocation2 + $0x24] sm:$0x1]  ;;  %v1957_v58 = vunpack.c.l.b16 %v1809_v40  ;;  %v1963_v17 = vshrl.u32 %v1958_v20, 16  ;;  %v3766_v20 = vld [vmem:[%s4203_s25 + $0x138] sm:$0xf] }
 0x154   : > { %2918 = vmatpush.bf16.msra.mxu3 %v3968_v28  ;;  %v1918_v32 = vor.u32 %v1917_v22, %v1913_v62  ;;  %v2188_v36 = vpack.c.b16 %v2027_v26, %v2021_v59  ;;  %v1975_v37 = vor.u32 %v1974_v45, %v1970_v27  ;;  %v1955_v47 = vunpack.c.l.b16 %v1808_v16 }
 0x155   : > { %v2026_v44 = vunpack.c.l.b16 %v1925_v3  ;;  %v1968_v5 = vor.u32 %v1967_v14, %v1963_v17  ;;  %v1961_v28 = vpack.c.b16 %v1957_v58, %v1956_v52  ;;  %v1995_v48 = vunpack.c.l.b16 %v1811_v46 }
 0x156   : > { %v2020_v21 = vunpack.c.l.b16 %v1918_v32  ;;  %v2016_v29 = vunpack.c.l.b16 %v1975_v37  ;;  %v1960_v49 = vpack.c.b16 %v1955_v47, %v1954_v51  ;;  %v1994_v56 = vunpack.c.l.b16 %v1810_v41 }
 0x157   : > { %2800 = vmatpush.bf16.msra.mxu2 %v3956_v60  ;;  %v2010_v54 = vunpack.c.l.b16 %v1968_v5  ;;  %v1999_v60 = vpack.c.b16 %v1953_v30, %v1995_v48  ;;  %v1986_v63 = vshll.u32 %v1961_v28, 16  ;;  %v3763_v52 = vor.u32 %v3965_v0, %v3762_v33 }
 0x158   : > { %2919 = vmatpush.bf16.msra.mxu3 %v3967_v11  ;;  %v2187_v6 = vpack.c.b16 %v2026_v44, %v2020_v21  ;;  %v1998_v18 = vpack.c.b16 %v1951_v9, %v1994_v56  ;;  %v1979_v19 = vshll.u32 %v1960_v49, 16  ;;  %v1984_v31 = vshrl.u32 %v1961_v28, 16 }
 0x159   : > { %v2181_v53 = vpack.c.b16 %v2016_v29, %v2010_v54  ;;  %v1988_v38 = vrot.slane %v1986_v63, 1  ;;  %v1977_v57 = vshrl.u32 %v1960_v49, 16  ;;  %v1997_v9 = vunpack.c.l.b16 %v1813_v1 }
 0x15a   : > { %2745 = vmatmul.bf16.vlgmr.msrb.gmra.mxu3 %v2179_v8  ;;  %v2003_v8 = vrot.slane %v1999_v60, 1  ;;  %v2002_v10 = vrot.slane %v1998_v18, 1  ;;  %v1981_v11 = vrot.slane %v1979_v19, 1  ;;  %v3767_v24 = vor.u32 %v3966_v25, %v3766_v20 }
 0x15b   : > { %2801 = vmatpush.bf16.msra.mxu2 %v3955_v43  ;;  %v1989_v51 = vor.u32 %v1988_v38, %v1984_v31  ;;  %v2001_v35 = vpack.c.b16 %v1957_v58, %v1997_v9  ;;  %v4030_v31 = vld [vmem:[%s5100_s5] ss:$0 sm:$0xff] }
 0x15c   : > { %v2017_v55 = vunpack.c.l.b16 %v2003_v8  ;;  %v2011_v30 = vunpack.c.l.b16 %v2002_v10  ;;  %v1982_v43 = vor.u32 %v1981_v11, %v1977_v57 }
 0x15d   : > { %v2028_v2 = vunpack.c.l.b16 %v1989_v51 }
 0x15e   : > { %2726 = vmatmul.bf16.vlgmr.msrb.gmra.mxu2 %v2178_v42  ;;  %v2182_v4 = vpack.c.b16 %v2017_v55, %v2011_v30  ;;  %v2022_v13 = vunpack.c.l.b16 %v1982_v43  ;;  %v1996_v42 = vunpack.c.l.b16 %v1812_v12  ;;  %v4029_v12 = vld [vmem:[%s5103_s8] ss:$0 sm:$0xff] }
 0x160   : > { %v2190_v15 = vpack.c.b16 %v2028_v2, %v2022_v13  ;;  %v2000_v23 = vpack.c.b16 %v1955_v47, %v1996_v42  ;;  %v4031_v2 = vld [vmem:[%s5101_s6] ss:$0 sm:$0xff] }
 0x162   : > { %2712 = vmatmul.bf16.gmra.mxu1 %v2186_v7  ;;  %v2005_v7 = vrot.slane %v2001_v35, 1  ;;  %v2004_v34 = vrot.slane %v2000_v23, 1 }
 0x164   : > { %v2029_v50 = vunpack.c.l.b16 %v2005_v7  ;;  %v2023_v22 = vunpack.c.l.b16 %v2004_v34 }
 0x166   : > { %v2191_v39 = vpack.c.b16 %v2029_v50, %v2023_v22 }
 0x16a   : > { %2750 = vmatmul.bf16.gmra.mxu3 %v2188_v36 }
 0x16e   : > { %2731 = vmatmul.bf16.gmra.mxu2 %v2187_v6 }
 0x172   : > { %2783 = vmatmul.bf16.vlgmr.msra.gmra.mxu1 %v2181_v53 }
 0x17a   : > { %2920 = vmatmul.bf16.vlgmr.msra.gmra.mxu3 %v3763_v52 }
 0x17e   : > { %2802 = vmatmul.bf16.vlgmr.msra.gmra.mxu2 %v2182_v4 }
 0x182   : > { %2788 = vmatmul.bf16.gmra.mxu1 %v2190_v15 }
 0x18a   : > { %2925 = vmatmul.bf16.gmra.mxu3 %v3767_v24 }
 0x18e   : > { %2807 = vmatmul.bf16.gmra.mxu2 %v2191_v39 }
 0x1af   : > { %v2651_v61 = vpop.f32.mrf.mxu1 }
 0x1b7   : > { %v2653_v26 = vpop.f32.mrf.mxu1 }
 0x1bc   : > { %v2689_v62 = vpop.f32.mrf.mxu3 }
 0x1bf   : > { %v2656_v3 = vpop.f32.mrf.mxu1 }
 0x1c0   : > { %v2765_v54 = vpop.f32.mrf.mxu0 }
 0x1c1   : > { %v2670_v45 = vpop.f32.mrf.mxu2 }
 0x1c2   : > { %v2671_v28 = vadd.f32 %v2670_v45, %v2651_v61 }
 0x1c4   : > { %v2691_v40 = vpop.f32.mrf.mxu3  ;;  %v2690_v29 = vadd.f32 %v2689_v62, %v2671_v28 }
 0x1c7   : > { %v2658_v59 = vpop.f32.mrf.mxu1 }
 0x1c8   : > { %v2767_v10 = vpop.f32.mrf.mxu0 }
 0x1c9   : > { %v2672_v32 = vpop.f32.mrf.mxu2 }
 0x1ca   : > { %v2673_v56 = vadd.f32 %v2672_v32, %v2653_v26  ;;  %v4032_v26 = vld [vmem:[%s5104_s9] ss:$0 sm:$0xff] }
 0x1cc   : > { %v2692_v33 = vadd.f32 %v2691_v40, %v2673_v56 }
 0x1cd   : > { %v2694_v14 = vpop.f32.mrf.mxu3 }
 0x1cf   : > { %v2708_v27 = vpop.f32.mrf.mxu1 }
 0x1d0   : > { %v2709_v48 = vadd.f32 %v2708_v27, %v2690_v29  ;;  %v2770_v50 = vpop.f32.mrf.mxu0 }
 0x1d1   : > { %v2675_v16 = vpop.f32.mrf.mxu2 }
 0x1d2   : > { %v2676_v8 = vadd.f32 %v2675_v16, %v2656_v3 }
 0x1d4   : > { %v2695_v51 = vadd.f32 %v2694_v14, %v2676_v8 }
 0x1d5   : > { %v2696_v36 = vpop.f32.mrf.mxu3 }
 0x1d7   : > { %v2710_v44 = vpop.f32.mrf.mxu1 }
 0x1d8   : > { %v2711_v18 = vadd.f32 %v2710_v44, %v2692_v33 }
 0x1d9   : > { %v2677_v58 = vpop.f32.mrf.mxu2 }
 0x1da   : > { %v2678_v9 = vadd.f32 %v2677_v58, %v2658_v59 }
 0x1dc   : > { %v2697_v7 = vadd.f32 %v2696_v36, %v2678_v9 }
 0x1dd   : > { %v2746_v17 = vpop.f32.mrf.mxu3 }
 0x1df   : > { %v2713_v46 = vpop.f32.mrf.mxu1 }
 0x1e0   : > { %v2714_v43 = vadd.f32 %v2713_v46, %v2695_v51 }
 0x1e1   : > { %v2727_v37 = vpop.f32.mrf.mxu2 }
 0x1e2   : > { %v2728_v53 = vadd.f32 %v2727_v37, %v2709_v48 }
 0x1e4   : > { %v2747_v0 = vadd.f32 %v2746_v17, %v2728_v53 }
 0x1e5   : > { %v2748_v47 = vpop.f32.mrf.mxu3 }
 0x1e6   : > { %v2766_v52 = vadd.f32 %v2765_v54, %v2747_v0 }
 0x1e7   : > { %v2715_v41 = vpop.f32.mrf.mxu1 }
 0x1e8   : > { %v2716_v39 = vadd.f32 %v2715_v41, %v2697_v7 }
 0x1e9   : > { %v2729_v21 = vpop.f32.mrf.mxu2 }
 0x1ea   : > { %v2730_v38 = vadd.f32 %v2729_v21, %v2711_v18  ;;  %v2772_v21 = vpop.f32.mrf.mxu0 }
 0x1ec   : > { %v2749_v1 = vadd.f32 %v2748_v47, %v2730_v38 }
 0x1ed   : > { %v2751_v5 = vpop.f32.mrf.mxu3 }
 0x1ee   : > { %v2768_v42 = vadd.f32 %v2767_v10, %v2749_v1 }
 0x1ef   : > { %v2784_v60 = vpop.f32.mrf.mxu1 }
 0x1f0   : > { %v2785_v11 = vadd.f32 %v2784_v60, %v2766_v52 }
 0x1f1   : > { %v2732_v6 = vpop.f32.mrf.mxu2 }
 0x1f2   : > { %v2733_v13 = vadd.f32 %v2732_v6, %v2714_v43 }
 0x1f4   : > { %v2752_v24 = vadd.f32 %v2751_v5, %v2733_v13 }
 0x1f5   : > { %v2753_v49 = vpop.f32.mrf.mxu3 }
 0x1f6   : > { %v2771_v45 = vadd.f32 %v2770_v50, %v2752_v24 }
 0x1f7   : > { %v2786_v55 = vpop.f32.mrf.mxu1 }
 0x1f8   : > { %v2787_v35 = vadd.f32 %v2786_v55, %v2768_v42 }
 0x1f9   : > { %v2734_v63 = vpop.f32.mrf.mxu2 }
 0x1fa   : > { %v2735_v3 = vadd.f32 %v2734_v63, %v2716_v39 }
 0x1fc   : > { %v2754_v58 = vadd.f32 %v2753_v49, %v2735_v3 }
 0x1fd   : > { %v2921_v19 = vpop.f32.mrf.mxu3 }
 0x1fe   : > { %v2935_v20 = vmul.f32 %v4029_v12, %v2921_v19  ;;  %v2773_v41 = vadd.f32 %v2772_v21, %v2754_v58 }
 0x1ff   : > { %v2789_v22 = vpop.f32.mrf.mxu1 }
 0x200   : > { %v2790_v32 = vadd.f32 %v2789_v22, %v2771_v45 }
 0x201   : > { %v2803_v57 = vpop.f32.mrf.mxu2 }
 0x202   : > { %v2804_v30 = vadd.f32 %v2803_v57, %v2785_v11 }
 0x204   : > { %v2817_v4 = vmul.f32 %v4030_v31, %v2804_v30 }
 0x205   : > { %v2923_v15 = vpop.f32.mrf.mxu3 }
 0x206   : > { %v2825_v25 = vadd.f32 %v4031_v2, %v2817_v4  ;;  %v2936_v40 = vmul.f32 %v4029_v12, %v2923_v15 }
 0x207   : > { %v2791_v5 = vpop.f32.mrf.mxu1 }
 0x208   : > { %v2939_v61 = vadd.f32 %v2935_v20, %v2825_v25  ;;  %v2792_v6 = vadd.f32 %v2791_v5, %v2773_v41 }
 0x209   : > { %v2805_v23 = vpop.f32.mrf.mxu2 }
 0x20a   : > { %v2806_v34 = vadd.f32 %v2805_v23, %v2787_v35  ;;  %v2947_v14 = vadd.f32 %v4032_v26, %v2939_v61 }
 0x20c   : > { %v2818_v62 = vmul.f32 %v4030_v31, %v2806_v34  ;;  %v2951_v37 = vmax.f32 %v2947_v14, 0.0 }
 0x20d   : > { %v2926_v16 = vpop.f32.mrf.mxu3 }
 0x20e   : > { %v2826_v59 = vadd.f32 %v4031_v2, %v2818_v62  ;;  %v2937_v29 = vmul.f32 %v4029_v12, %v2926_v16 }
 0x210   : > { %v2940_v27 = vadd.f32 %v2936_v40, %v2826_v59 }
 0x211   : > { %v2808_v36 = vpop.f32.mrf.mxu2 }
 0x212   : > { %v2948_v44 = vadd.f32 %v4032_v26, %v2940_v27  ;;  %v2809_v17 = vadd.f32 %v2808_v36, %v2790_v32 }
 0x214   : > { %v2952_v46 = vmax.f32 %v2948_v44, 0.0  ;;  %v2819_v47 = vmul.f32 %v4030_v31, %v2809_v17 }
 0x215   : > { %v2928_v56 = vpop.f32.mrf.mxu3 }
 0x216   : > { %v3978_v28 = vpack.c.bf16 %v2952_v46, %v2951_v37  ;;  %v2827_v48 = vadd.f32 %v4031_v2, %v2819_v47  ;;  %v2938_v63 = vmul.f32 %v4029_v12, %v2928_v56 }
 0x218   : > { %3979 = vst [vmem:[%s381_s12] sm:$0xff] %v3978_v28   ;;  %v2941_v53 = vadd.f32 %v2937_v29, %v2827_v48 }
 0x219   : > { %v2810_v54 = vpop.f32.mrf.mxu2 }
 0x21a   : > { %v2811_v49 = vadd.f32 %v2810_v54, %v2792_v6  ;;  %v2949_v0 = vadd.f32 %v4032_v26, %v2941_v53 }
 0x21c   : > { %v2820_v60 = vmul.f32 %v4030_v31, %v2811_v49  ;;  %v2953_v8 = vmax.f32 %v2949_v0, 0.0 }
 0x21e   : > { %v2828_v33 = vadd.f32 %v4031_v2, %v2820_v60 }
 0x220   : > { %v2942_v18 = vadd.f32 %v2938_v63, %v2828_v33 }
 0x222   : > { %v2950_v19 = vadd.f32 %v4032_v26, %v2942_v18 }
 0x224   : > { %v2954_v38 = vmax.f32 %v2950_v19, 0.0 }
 0x226   : > { %v3983_v52 = vpack.c.bf16 %v2954_v38, %v2953_v8 }
 0x228   : > { %3985 = vst [vmem:[%s381_s12 + $0x8] sm:$0xff] %v3983_v52  }
 0x229 PF: > { %s20_s17 = sadd.s32 1, %s4071_s17   ;;  %s5125_s26 = sld [smem:[#allocation3_spill]] }
 0x22a   : > { %p17_p7 = scmp.ge.s32.totalorder %s20_s17, 6   ;;  %s5126_s13 = smov %s4063_s15 }
 0x22b   : > { %s5127_s14 = smov %s4067_s16  ;;  %s5128_s15 = smov %s5131_s18 }
 0x22c   :  { %19 = sbr.rel (!%p17_p7) target bundleno = 3 (0x3), region = 99 }
 0x22f   : > { %s5129_s16 = smov %s5125_s26 }

</bundles_post_ra>
